<compile_context>
chip_gen: v7x
topology: tpu7x:2x2x1
jax: 0.10.0
libtpu: 0.0.40
codegen_flags: <defaults>
</compile_context>

<pallas_src>
import jax
import jax.numpy as jnp
from jax.experimental import pallas as pl
from jax.experimental.pallas import tpu as pltpu

# ----------------------- model configuration (small) -----------------------
B = 2                       # batch
C = 4                       # image channels
IMG = 16                    # image height == width
PSZ = 4                     # patch size
GP = IMG // PSZ             # patches per side
NP = GP * GP                # patches per image (16)
S = NP + 1                  # sequence length incl. cls token (17)
S_PAD = 24                  # 8-sublane-aligned padded sequence length
PATCH_DIM = C * PSZ * PSZ   # flattened patch dim (64)
D = 32                      # d_model
H = 4                       # attention heads
HD = D // H                 # head dim
F = 64                      # dim_ff
NUM_LAYERS = 2              # encoder layers
EPS = 1e-5                  # LayerNorm eps (PyTorch default)
NEG = -1e30                 # additive attention-mask value for pad key columns


# ------------------------------- kernel --------------------------------------
def vit_kernel(patches_ref, w_patch_ref, b_patch_ref, cls_ref, pe_ref,
               wqkv_ref, bqkv_ref, wo_ref, bo_ref,
               w1_ref, bf1_ref, w2_ref, bf2_ref,
               g1_ref, be1_ref, g2_ref, be2_ref,
               o_ref):
    """Grid = (batch, layer).  o_ref block is resident across the layer axis and
    doubles as the activation state (written at layer 0 by the embed branch)."""
    layer = pl.program_id(1)

    # ---- fused embedding: patch matmul + cls + positional encoding ----------
    @pl.when(layer == 0)
    def _():
        emb = jnp.dot(patches_ref[0], w_patch_ref[...],
                      preferred_element_type=jnp.float32) + b_patch_ref[...]
        x0 = jnp.concatenate(
            [cls_ref[...], emb, jnp.zeros((S_PAD - S, D), jnp.float32)], axis=0)
        o_ref[0] = x0 + pe_ref[...]                       # one dense (S_PAD, D) store

    x = o_ref[0]                                          # (S_PAD, D) resident state

    # Hoist this layer's params once (avoid per-use broadcast re-materialization).
    wqkv = wqkv_ref[0]                                    # (D, 3D)
    bqkv = bqkv_ref[0]                                    # (1, 3D)
    wo, bo = wo_ref[0], bo_ref[0]
    w1, bf1 = w1_ref[0], bf1_ref[0]
    w2, bf2 = w2_ref[0], bf2_ref[0]
    g1, be1 = g1_ref[0], be1_ref[0]
    g2, be2 = g2_ref[0], be2_ref[0]

    # In-kernel additive key mask for the pad columns (no (R,R) HBM bias).
    col = jax.lax.broadcasted_iota(jnp.int32, (S_PAD, S_PAD), 1)
    kmask = jnp.where(col < S, 0.0, NEG)

    # ---- fused Q|K|V projection: one (S_PAD,D)@(D,3D) MXU pass --------------
    qkv = jnp.dot(x, wqkv, preferred_element_type=jnp.float32) + bqkv

    # ---- per-head attention (reference MHA applies NO 1/sqrt(hd) scale) -----
    # Heads stay as static lane slices; output projection is folded per head
    # (p @ (v @ wo_head)) and accumulated -> no head stack / lane concat.
    attn = jnp.zeros((S_PAD, D), jnp.float32)
    for h in range(H):                                    # H=4, static unroll
        qh = qkv[:, 0 * D + h * HD: 0 * D + (h + 1) * HD]
        kh = qkv[:, 1 * D + h * HD: 1 * D + (h + 1) * HD]
        vh = qkv[:, 2 * D + h * HD: 2 * D + (h + 1) * HD]
        s = jax.lax.dot_general(qh, kh, (((1,), (1,)), ((), ())),
                                preferred_element_type=jnp.float32)   # (S_PAD, S_PAD)
        s = s + kmask
        s = s - jnp.max(s, axis=-1, keepdims=True)
        p = jnp.exp(s)
        p = p * pl.reciprocal(jnp.sum(p, axis=-1, keepdims=True), approx=False)
        vproj = jnp.dot(vh, wo[h * HD:(h + 1) * HD, :],
                        preferred_element_type=jnp.float32)           # (S_PAD, D)
        attn = attn + jnp.dot(p, vproj, preferred_element_type=jnp.float32)
    attn = attn + bo

    # ---- residual + LayerNorm 1 ---------------------------------------------
    x = x + attn
    mu = jnp.mean(x, axis=-1, keepdims=True)
    var = jnp.mean((x - mu) * (x - mu), axis=-1, keepdims=True)
    x = (x - mu) * jax.lax.rsqrt(var + EPS) * g1 + be1

    # ---- feed-forward + residual + LayerNorm 2 -------------------------------
    h1 = jnp.maximum(jnp.dot(x, w1, preferred_element_type=jnp.float32) + bf1, 0.0)
    ff = jnp.dot(h1, w2, preferred_element_type=jnp.float32) + bf2
    x = x + ff
    mu = jnp.mean(x, axis=-1, keepdims=True)
    var = jnp.mean((x - mu) * (x - mu), axis=-1, keepdims=True)
    x = (x - mu) * jax.lax.rsqrt(var + EPS) * g2 + be2

    o_ref[0] = x


# ------------------------------- wrappers ------------------------------------
def _im2col(x):
    # (B, C, IMG, IMG) -> (B, NP, PATCH_DIM); patch-vector order (c, ph, pw)
    # matches Conv2d(kernel=stride=patch) flattened weights.  Pure layout.
    p = x.reshape(B, C, GP, PSZ, GP, PSZ).transpose(0, 2, 4, 1, 3, 5)
    return p.reshape(B, NP, PATCH_DIM)


@jax.jit
def vit_forward(x, pk):
    patches = _im2col(x)
    const = lambda b, l: (0, 0)          # embed params: fetched once, stay resident
    per_layer3 = lambda b, l: (l, 0, 0)  # stacked per-layer weights
    out = pl.pallas_call(
        vit_kernel,
        out_shape=jax.ShapeDtypeStruct((B, S_PAD, D), jnp.float32),
        grid_spec=pltpu.PrefetchScalarGridSpec(
            num_scalar_prefetch=0,
            grid=(B, NUM_LAYERS),
            in_specs=[
                pl.BlockSpec((1, NP, PATCH_DIM), lambda b, l: (b, 0, 0)),
                pl.BlockSpec((PATCH_DIM, D), const),
                pl.BlockSpec((1, D), const),
                pl.BlockSpec((1, D), const),
                pl.BlockSpec((S_PAD, D), const),
                pl.BlockSpec((1, D, 3 * D), per_layer3),
                pl.BlockSpec((1, 1, 3 * D), per_layer3),
                pl.BlockSpec((1, D, D), per_layer3),
                pl.BlockSpec((1, 1, D), per_layer3),
                pl.BlockSpec((1, D, F), per_layer3),
                pl.BlockSpec((1, 1, F), per_layer3),
                pl.BlockSpec((1, F, D), per_layer3),
                pl.BlockSpec((1, 1, D), per_layer3),
                pl.BlockSpec((1, 1, D), per_layer3),
                pl.BlockSpec((1, 1, D), per_layer3),
                pl.BlockSpec((1, 1, D), per_layer3),
                pl.BlockSpec((1, 1, D), per_layer3),
            ],
            out_specs=pl.BlockSpec((1, S_PAD, D), lambda b, l: (b, 0, 0)),
        ),
        compiler_params=pltpu.CompilerParams(
            dimension_semantics=("parallel", "arbitrary")),
    )(patches, pk["w_patch"], pk["b_patch"], pk["cls"], pk["pe"],
      pk["wqkv"], pk["bqkv"], pk["wo"], pk["bo"],
      pk["w1"], pk["bf1"], pk["w2"], pk["bf2"],
      pk["g1"], pk["be1"], pk["g2"], pk["be2"])
    return out[:, :S, :]                                 # drop pad rows


# ------------------------- pure-JAX reference --------------------------------
def _layer_norm(t, g, b):
    mu = t.mean(-1, keepdims=True)
    var = ((t - mu) ** 2).mean(-1, keepdims=True)
    return (t - mu) * jax.lax.rsqrt(var + EPS) * g + b


def vit_ref(x, params):
    patches = _im2col(x)
    emb = patches @ params["w_patch"] + params["b_patch"]
    cls = jnp.broadcast_to(params["cls"], (B, 1, D))
    h = jnp.concatenate([cls, emb], axis=1) + params["pe"][None, :, :]
    for lp in params["layers"]:
        q = h @ lp["wq"] + lp["bq"]
        k = h @ lp["wk"] + lp["bk"]
        v = h @ lp["wv"] + lp["bv"]
        qh = q.reshape(B, S, H, HD)
        kh = k.reshape(B, S, H, HD)
        vh = v.reshape(B, S, H, HD)
        s = jnp.einsum("bqhd,bkhd->bhqk", qh, kh)   # no scaling (matches MHA module)
        p = jax.nn.softmax(s, axis=-1)
        a = jnp.einsum("bhqk,bkhd->bqhd", p, vh).reshape(B, S, D)
        a = a @ lp["wo"] + lp["bo"]
        h = _layer_norm(h + a, lp["g1"], lp["be1"])
        ff = jnp.maximum(h @ lp["w1"] + lp["bf1"], 0.0) @ lp["w2"] + lp["bf2"]
        h = _layer_norm(h + ff, lp["g2"], lp["be2"])
    return h


# ------------------------------- params --------------------------------------
def positional_encoding(length, dim):
    # Matches PositionalEncoding1D: pe[pos, 2i] = sin(pos/10000^(2i/dim)),
    #                               pe[pos, 2i+1] = cos(pos/10000^(2i/dim)).
    div = jnp.exp(-jnp.arange(0.0, dim, 2) / dim * jnp.log(10000.0))    # (dim/2,)
    pos = jnp.arange(0.0, length)
    ang = pos[:, None] * div[None, :]                                   # (length, dim/2)
    pe = jnp.zeros((length, dim), jnp.float32)
    pe = pe.at[:, 0::2].set(jnp.sin(ang))
    pe = pe.at[:, 1::2].set(jnp.cos(ang))
    return pe


def make_params(key):
    sc = 0.05
    n = jax.random.normal
    k = jax.random.split(key, 3)
    params = {
        "w_patch": sc * n(k[0], (PATCH_DIM, D), jnp.float32),  # Conv2d as matmul
        "b_patch": sc * n(k[1], (1, D), jnp.float32),
        "cls":     sc * n(k[2], (1, D), jnp.float32),          # random for a non-trivial test
        "pe":      positional_encoding(S, D),
        "layers":  [],
    }
    for l in range(NUM_LAYERS):
        kl = jax.random.split(jax.random.fold_in(key, 100 + l), 12)
        params["layers"].append({
            "wq": sc * n(kl[0], (D, D), jnp.float32), "bq": sc * n(kl[1], (1, D), jnp.float32),
            "wk": sc * n(kl[2], (D, D), jnp.float32), "bk": sc * n(kl[3], (1, D), jnp.float32),
            "wv": sc * n(kl[4], (D, D), jnp.float32), "bv": sc * n(kl[5], (1, D), jnp.float32),
            "wo": sc * n(kl[6], (D, D), jnp.float32), "bo": sc * n(kl[7], (1, D), jnp.float32),
            "w1": sc * n(kl[8], (D, F), jnp.float32), "bf1": sc * n(kl[9], (1, F), jnp.float32),
            "w2": sc * n(kl[10], (F, D), jnp.float32), "bf2": sc * n(kl[11], (1, D), jnp.float32),
            # LayerNorm affine params: PyTorch default init (ones / zeros)
            "g1": jnp.ones((1, D), jnp.float32), "be1": jnp.zeros((1, D), jnp.float32),
            "g2": jnp.ones((1, D), jnp.float32), "be2": jnp.zeros((1, D), jnp.float32),
        })
    return params


def pack_params(params):
    """One-time packing: fused QKV weights, stacked per-layer leading axis,
    zero-padded positional encoding (done here, NOT per forward call)."""
    ls = params["layers"]
    stack = lambda name: jnp.stack([lp[name] for lp in ls], axis=0)
    pe_pad = jnp.concatenate(
        [params["pe"], jnp.zeros((S_PAD - S, D), jnp.float32)], axis=0)
    return {
        "w_patch": params["w_patch"],
        "b_patch": params["b_patch"],
        "cls": params["cls"],
        "pe": pe_pad,                                                    # (S_PAD, D)
        "wqkv": jnp.stack(
            [jnp.concatenate([lp["wq"], lp["wk"], lp["wv"]], axis=1) for lp in ls], 0),
        "bqkv": jnp.stack(
            [jnp.concatenate([lp["bq"], lp["bk"], lp["bv"]], axis=1) for lp in ls], 0),
        "wo": stack("wo"), "bo": stack("bo"),
        "w1": stack("w1"), "bf1": stack("bf1"),
        "w2": stack("w2"), "bf2": stack("bf2"),
        "g1": stack("g1"), "be1": stack("be1"),
        "g2": stack("g2"), "be2": stack("be2"),
    }


# --------------------------------- main ---------------------------------------
if __name__ == "__main__":
    key = jax.random.PRNGKey(0)
    kx, kp = jax.random.split(key)
    x = jax.random.normal(kx, (B, C, IMG, IMG), jnp.float32)
    params = make_params(kp)
    packed = pack_params(params)

    out = jax.block_until_ready(vit_forward(x, packed))
    ref = vit_ref(x, params)

    assert out.shape == (B, S, D)
    err = float(jnp.max(jnp.abs(out - ref)))
    assert jnp.allclose(out, ref, atol=1e-3, rtol=1e-3), f"max err {err}"
    print("KERNEL_OK")
</pallas_src>

<mosaic_0001>
module attributes {stable_mosaic.version = 11 : i64} {
  func.func @vit_kernel(%arg0: i32, %arg1: i32, %arg2: memref<1x16x64xf32, #tpu.memory_space<vmem>>, %arg3: memref<64x32xf32, #tpu.memory_space<vmem>>, %arg4: memref<1x32xf32, #tpu.memory_space<vmem>>, %arg5: memref<1x32xf32, #tpu.memory_space<vmem>>, %arg6: memref<24x32xf32, #tpu.memory_space<vmem>>, %arg7: memref<1x32x96xf32, #tpu.memory_space<vmem>>, %arg8: memref<1x1x96xf32, #tpu.memory_space<vmem>>, %arg9: memref<1x32x32xf32, #tpu.memory_space<vmem>>, %arg10: memref<1x1x32xf32, #tpu.memory_space<vmem>>, %arg11: memref<1x32x64xf32, #tpu.memory_space<vmem>>, %arg12: memref<1x1x64xf32, #tpu.memory_space<vmem>>, %arg13: memref<1x64x32xf32, #tpu.memory_space<vmem>>, %arg14: memref<1x1x32xf32, #tpu.memory_space<vmem>>, %arg15: memref<1x1x32xf32, #tpu.memory_space<vmem>>, %arg16: memref<1x1x32xf32, #tpu.memory_space<vmem>>, %arg17: memref<1x1x32xf32, #tpu.memory_space<vmem>>, %arg18: memref<1x1x32xf32, #tpu.memory_space<vmem>>, %arg19: memref<1x24x32xf32, #tpu.memory_space<vmem>>) attributes {dimension_semantics = [#tpu.dimension_semantics<parallel>, #tpu.dimension_semantics<arbitrary>], iteration_bounds = array<i64: 2, 2>, scalar_prefetch = 0 : i64, scratch_operands = 0 : i64, tpu.core_type = #tpu.core_type<tc>, window_params = [{transform_indices = @transform_0, window_bounds = array<i64: 1, 16, 64>}, {pipeline_mode = #tpu.pipeline_mode<synchronous>, transform_indices = @transform_1, window_bounds = array<i64: 64, 32>}, {pipeline_mode = #tpu.pipeline_mode<synchronous>, transform_indices = @transform_2, window_bounds = array<i64: 1, 32>}, {pipeline_mode = #tpu.pipeline_mode<synchronous>, transform_indices = @transform_3, window_bounds = array<i64: 1, 32>}, {pipeline_mode = #tpu.pipeline_mode<synchronous>, transform_indices = @transform_4, window_bounds = array<i64: 24, 32>}, {transform_indices = @transform_5, window_bounds = array<i64: 1, 32, 96>}, {transform_indices = @transform_6, window_bounds = array<i64: 1, 1, 96>}, {transform_indices = @transform_7, window_bounds = array<i64: 1, 32, 32>}, {transform_indices = @transform_8, window_bounds = array<i64: 1, 1, 32>}, {transform_indices = @transform_9, window_bounds = array<i64: 1, 32, 64>}, {transform_indices = @transform_10, window_bounds = array<i64: 1, 1, 64>}, {transform_indices = @transform_11, window_bounds = array<i64: 1, 64, 32>}, {transform_indices = @transform_12, window_bounds = array<i64: 1, 1, 32>}, {transform_indices = @transform_13, window_bounds = array<i64: 1, 1, 32>}, {transform_indices = @transform_14, window_bounds = array<i64: 1, 1, 32>}, {transform_indices = @transform_15, window_bounds = array<i64: 1, 1, 32>}, {transform_indices = @transform_16, window_bounds = array<i64: 1, 1, 32>}, {transform_indices = @transform_17, window_bounds = array<i64: 1, 24, 32>}]} {
    %c0_i32 = arith.constant 0 : i32
    %0 = arith.cmpi eq, %arg1, %c0_i32 : i32
    %1 = arith.extui %0 : i1 to i32
    %c0_i32_0 = arith.constant 0 : i32
    %2 = arith.cmpi ne, %1, %c0_i32_0 : i32
    scf.if %2 {
      %c0_78 = arith.constant 0 : index
      %c0_79 = arith.constant 0 : index
      %c0_80 = arith.constant 0 : index
      %178 = vector.load %arg2[%c0_78, %c0_79, %c0_80] : memref<1x16x64xf32, #tpu.memory_space<vmem>>, vector<1x16x64xf32>
      %179 = vector.shape_cast %178 : vector<1x16x64xf32> to vector<16x64xf32>
      %c0_81 = arith.constant 0 : index
      %c0_82 = arith.constant 0 : index
      %180 = vector.load %arg3[%c0_81, %c0_82] : memref<64x32xf32, #tpu.memory_space<vmem>>, vector<64x32xf32>
      %cst_83 = arith.constant dense<0.000000e+00> : vector<16x32xf32>
      %181 = tpu.matmul %179, %180, %cst_83 {dimension_numbers = #tpu.dot_dimension_numbers<[1], [0], [0], [1], [0, 0, 1, 1], [], []>} : vector<16x64xf32>, vector<64x32xf32>, vector<16x32xf32> -> vector<16x32xf32>
      %c0_84 = arith.constant 0 : index
      %c0_85 = arith.constant 0 : index
      %182 = vector.load %arg4[%c0_84, %c0_85] : memref<1x32xf32, #tpu.memory_space<vmem>>, vector<1x32xf32>
      %183 = vector.broadcast %182 : vector<1x32xf32> to vector<16x32xf32>
      %184 = arith.addf %181, %183 : vector<16x32xf32>
      %c0_86 = arith.constant 0 : index
      %c0_87 = arith.constant 0 : index
      %185 = vector.load %arg5[%c0_86, %c0_87] : memref<1x32xf32, #tpu.memory_space<vmem>>, vector<1x32xf32>
      %cst_88 = arith.constant 0.000000e+00 : f32
      %186 = vector.broadcast %cst_88 : f32 to vector<7x32xf32>
      %187 = tpu.concatenate %185, %184, %186 in 0 : vector<1x32xf32>, vector<16x32xf32>, vector<7x32xf32> -> vector<24x32xf32>
      %c0_89 = arith.constant 0 : index
      %c0_90 = arith.constant 0 : index
      %188 = vector.load %arg6[%c0_89, %c0_90] : memref<24x32xf32, #tpu.memory_space<vmem>>, vector<24x32xf32>
      %189 = arith.addf %187, %188 : vector<24x32xf32>
      %c0_91 = arith.constant 0 : index
      %c0_92 = arith.constant 0 : index
      %c0_93 = arith.constant 0 : index
      %190 = vector.load %arg19[%c0_91, %c0_92, %c0_93] : memref<1x24x32xf32, #tpu.memory_space<vmem>>, vector<1x24x32xf32>
      %191 = vector.shape_cast %190 : vector<1x24x32xf32> to vector<24x32xf32>
      %192 = vector.shape_cast %189 : vector<24x32xf32> to vector<1x24x32xf32>
      tpu.vector_store %arg19[%c0_91, %c0_92, %c0_93], %192 {strides = array<i32>} : memref<1x24x32xf32, #tpu.memory_space<vmem>>, vector<1x24x32xf32>,
    } else {
    }
    %c0 = arith.constant 0 : index
    %c0_1 = arith.constant 0 : index
    %c0_2 = arith.constant 0 : index
    %3 = vector.load %arg19[%c0, %c0_1, %c0_2] : memref<1x24x32xf32, #tpu.memory_space<vmem>>, vector<1x24x32xf32>
    %4 = vector.shape_cast %3 : vector<1x24x32xf32> to vector<24x32xf32>
    %c0_3 = arith.constant 0 : index
    %c0_4 = arith.constant 0 : index
    %c0_5 = arith.constant 0 : index
    %5 = vector.load %arg7[%c0_3, %c0_4, %c0_5] : memref<1x32x96xf32, #tpu.memory_space<vmem>>, vector<1x32x96xf32>
    %6 = vector.shape_cast %5 : vector<1x32x96xf32> to vector<32x96xf32>
    %c0_6 = arith.constant 0 : index
    %c0_7 = arith.constant 0 : index
    %c0_8 = arith.constant 0 : index
    %7 = vector.load %arg8[%c0_6, %c0_7, %c0_8] : memref<1x1x96xf32, #tpu.memory_space<vmem>>, vector<1x1x96xf32>
    %8 = vector.shape_cast %7 : vector<1x1x96xf32> to vector<1x96xf32>
    %c0_9 = arith.constant 0 : index
    %c0_10 = arith.constant 0 : index
    %c0_11 = arith.constant 0 : index
    %9 = vector.load %arg9[%c0_9, %c0_10, %c0_11] : memref<1x32x32xf32, #tpu.memory_space<vmem>>, vector<1x32x32xf32>
    %10 = vector.shape_cast %9 : vector<1x32x32xf32> to vector<32x32xf32>
    %c0_12 = arith.constant 0 : index
    %c0_13 = arith.constant 0 : index
    %c0_14 = arith.constant 0 : index
    %11 = vector.load %arg10[%c0_12, %c0_13, %c0_14] : memref<1x1x32xf32, #tpu.memory_space<vmem>>, vector<1x1x32xf32>
    %12 = vector.shape_cast %11 : vector<1x1x32xf32> to vector<1x32xf32>
    %c0_15 = arith.constant 0 : index
    %c0_16 = arith.constant 0 : index
    %c0_17 = arith.constant 0 : index
    %13 = vector.load %arg11[%c0_15, %c0_16, %c0_17] : memref<1x32x64xf32, #tpu.memory_space<vmem>>, vector<1x32x64xf32>
    %14 = vector.shape_cast %13 : vector<1x32x64xf32> to vector<32x64xf32>
    %c0_18 = arith.constant 0 : index
    %c0_19 = arith.constant 0 : index
    %c0_20 = arith.constant 0 : index
    %15 = vector.load %arg12[%c0_18, %c0_19, %c0_20] : memref<1x1x64xf32, #tpu.memory_space<vmem>>, vector<1x1x64xf32>
    %16 = vector.shape_cast %15 : vector<1x1x64xf32> to vector<1x64xf32>
    %c0_21 = arith.constant 0 : index
    %c0_22 = arith.constant 0 : index
    %c0_23 = arith.constant 0 : index
    %17 = vector.load %arg13[%c0_21, %c0_22, %c0_23] : memref<1x64x32xf32, #tpu.memory_space<vmem>>, vector<1x64x32xf32>
    %18 = vector.shape_cast %17 : vector<1x64x32xf32> to vector<64x32xf32>
    %c0_24 = arith.constant 0 : index
    %c0_25 = arith.constant 0 : index
    %c0_26 = arith.constant 0 : index
    %19 = vector.load %arg14[%c0_24, %c0_25, %c0_26] : memref<1x1x32xf32, #tpu.memory_space<vmem>>, vector<1x1x32xf32>
    %20 = vector.shape_cast %19 : vector<1x1x32xf32> to vector<1x32xf32>
    %c0_27 = arith.constant 0 : index
    %c0_28 = arith.constant 0 : index
    %c0_29 = arith.constant 0 : index
    %21 = vector.load %arg15[%c0_27, %c0_28, %c0_29] : memref<1x1x32xf32, #tpu.memory_space<vmem>>, vector<1x1x32xf32>
    %22 = vector.shape_cast %21 : vector<1x1x32xf32> to vector<1x32xf32>
    %c0_30 = arith.constant 0 : index
    %c0_31 = arith.constant 0 : index
    %c0_32 = arith.constant 0 : index
    %23 = vector.load %arg16[%c0_30, %c0_31, %c0_32] : memref<1x1x32xf32, #tpu.memory_space<vmem>>, vector<1x1x32xf32>
    %24 = vector.shape_cast %23 : vector<1x1x32xf32> to vector<1x32xf32>
    %c0_33 = arith.constant 0 : index
    %c0_34 = arith.constant 0 : index
    %c0_35 = arith.constant 0 : index
    %25 = vector.load %arg17[%c0_33, %c0_34, %c0_35] : memref<1x1x32xf32, #tpu.memory_space<vmem>>, vector<1x1x32xf32>
    %26 = vector.shape_cast %25 : vector<1x1x32xf32> to vector<1x32xf32>
    %c0_36 = arith.constant 0 : index
    %c0_37 = arith.constant 0 : index
    %c0_38 = arith.constant 0 : index
    %27 = vector.load %arg18[%c0_36, %c0_37, %c0_38] : memref<1x1x32xf32, #tpu.memory_space<vmem>>, vector<1x1x32xf32>
    %28 = vector.shape_cast %27 : vector<1x1x32xf32> to vector<1x32xf32>
    %29 = tpu.iota {dimensions = array<i32: 1>} : vector<24x24xi32>
    %c17_i32 = arith.constant 17 : i32
    %30 = vector.broadcast %c17_i32 : i32 to vector<24x24xi32>
    %31 = arith.cmpi slt, %29, %30 : vector<24x24xi32>
    %cst = arith.constant 0.000000e+00 : f32
    %cst_39 = arith.constant -1.000000e+30 : f32
    %32 = vector.broadcast %cst : f32 to vector<24x24xf32>
    %33 = vector.broadcast %cst_39 : f32 to vector<24x24xf32>
    %34 = arith.select %31, %32, %33 : vector<24x24xi1>, vector<24x24xf32>
    %cst_40 = arith.constant dense<0.000000e+00> : vector<24x96xf32>
    %35 = tpu.matmul %4, %6, %cst_40 {dimension_numbers = #tpu.dot_dimension_numbers<[1], [0], [0], [1], [0, 0, 1, 1], [], []>} : vector<24x32xf32>, vector<32x96xf32>, vector<24x96xf32> -> vector<24x96xf32>
    %36 = vector.broadcast %8 : vector<1x96xf32> to vector<24x96xf32>
    %37 = arith.addf %35, %36 : vector<24x96xf32>
    %cst_41 = arith.constant 0.000000e+00 : f32
    %38 = vector.broadcast %cst_41 : f32 to vector<24x32xf32>
    %39 = vector.extract_strided_slice %37 {offsets = [0, 0], sizes = [24, 8], strides = [1, 1]} : vector<24x96xf32> to vector<24x8xf32>
    %40 = vector.extract_strided_slice %37 {offsets = [0, 32], sizes = [24, 8], strides = [1, 1]} : vector<24x96xf32> to vector<24x8xf32>
    %41 = vector.extract_strided_slice %37 {offsets = [0, 64], sizes = [24, 8], strides = [1, 1]} : vector<24x96xf32> to vector<24x8xf32>
    %cst_42 = arith.constant dense<0.000000e+00> : vector<24x24xf32>
    %42 = tpu.matmul %39, %40, %cst_42 {dimension_numbers = #tpu.dot_dimension_numbers<[1], [1], [0], [0], [0, 0, 1, 0], [], []>} : vector<24x8xf32>, vector<24x8xf32>, vector<24x24xf32> -> vector<24x24xf32>
    %43 = arith.addf %42, %34 : vector<24x24xf32>
    %cst_43 = arith.constant dense<0xFF800000> : vector<24xf32>
    %44 = vector.multi_reduction <maximumf>, %43, %cst_43 [1] : vector<24x24xf32> to vector<24xf32>
    %45 = vector.shape_cast %44 : vector<24xf32> to vector<24x1xf32>
    %46 = vector.broadcast %45 : vector<24x1xf32> to vector<24x24xf32>
    %47 = arith.subf %43, %46 : vector<24x24xf32>
    %48 = math.exp %47 : vector<24x24xf32>
    %cst_44 = arith.constant dense<0.000000e+00> : vector<24xf32>
    %49 = vector.multi_reduction <add>, %48, %cst_44 [1] : vector<24x24xf32> to vector<24xf32>
    %50 = vector.shape_cast %49 : vector<24xf32> to vector<24x1xf32>
    %51 = tpu.reciprocal %50 : vector<24x1xf32> -> vector<24x1xf32>
    %52 = vector.broadcast %51 : vector<24x1xf32> to vector<24x24xf32>
    %53 = arith.mulf %48, %52 : vector<24x24xf32>
    %54 = vector.extract_strided_slice %10 {offsets = [0, 0], sizes = [8, 32], strides = [1, 1]} : vector<32x32xf32> to vector<8x32xf32>
    %cst_45 = arith.constant dense<0.000000e+00> : vector<24x32xf32>
    %55 = tpu.matmul %41, %54, %cst_45 {dimension_numbers = #tpu.dot_dimension_numbers<[1], [0], [0], [1], [0, 0, 1, 1], [], []>} : vector<24x8xf32>, vector<8x32xf32>, vector<24x32xf32> -> vector<24x32xf32>
    %cst_46 = arith.constant dense<0.000000e+00> : vector<24x32xf32>
    %56 = tpu.matmul %53, %55, %cst_46 {dimension_numbers = #tpu.dot_dimension_numbers<[1], [0], [0], [1], [0, 0, 1, 1], [], []>} : vector<24x24xf32>, vector<24x32xf32>, vector<24x32xf32> -> vector<24x32xf32>
    %57 = arith.addf %38, %56 : vector<24x32xf32>
    %58 = vector.extract_strided_slice %37 {offsets = [0, 8], sizes = [24, 8], strides = [1, 1]} : vector<24x96xf32> to vector<24x8xf32>
    %59 = vector.extract_strided_slice %37 {offsets = [0, 40], sizes = [24, 8], strides = [1, 1]} : vector<24x96xf32> to vector<24x8xf32>
    %60 = vector.extract_strided_slice %37 {offsets = [0, 72], sizes = [24, 8], strides = [1, 1]} : vector<24x96xf32> to vector<24x8xf32>
    %cst_47 = arith.constant dense<0.000000e+00> : vector<24x24xf32>
    %61 = tpu.matmul %58, %59, %cst_47 {dimension_numbers = #tpu.dot_dimension_numbers<[1], [1], [0], [0], [0, 0, 1, 0], [], []>} : vector<24x8xf32>, vector<24x8xf32>, vector<24x24xf32> -> vector<24x24xf32>
    %62 = arith.addf %61, %34 : vector<24x24xf32>
    %cst_48 = arith.constant dense<0xFF800000> : vector<24xf32>
    %63 = vector.multi_reduction <maximumf>, %62, %cst_48 [1] : vector<24x24xf32> to vector<24xf32>
    %64 = vector.shape_cast %63 : vector<24xf32> to vector<24x1xf32>
    %65 = vector.broadcast %64 : vector<24x1xf32> to vector<24x24xf32>
    %66 = arith.subf %62, %65 : vector<24x24xf32>
    %67 = math.exp %66 : vector<24x24xf32>
    %cst_49 = arith.constant dense<0.000000e+00> : vector<24xf32>
    %68 = vector.multi_reduction <add>, %67, %cst_49 [1] : vector<24x24xf32> to vector<24xf32>
    %69 = vector.shape_cast %68 : vector<24xf32> to vector<24x1xf32>
    %70 = tpu.reciprocal %69 : vector<24x1xf32> -> vector<24x1xf32>
    %71 = vector.broadcast %70 : vector<24x1xf32> to vector<24x24xf32>
    %72 = arith.mulf %67, %71 : vector<24x24xf32>
    %73 = vector.extract_strided_slice %10 {offsets = [8, 0], sizes = [8, 32], strides = [1, 1]} : vector<32x32xf32> to vector<8x32xf32>
    %cst_50 = arith.constant dense<0.000000e+00> : vector<24x32xf32>
    %74 = tpu.matmul %60, %73, %cst_50 {dimension_numbers = #tpu.dot_dimension_numbers<[1], [0], [0], [1], [0, 0, 1, 1], [], []>} : vector<24x8xf32>, vector<8x32xf32>, vector<24x32xf32> -> vector<24x32xf32>
    %cst_51 = arith.constant dense<0.000000e+00> : vector<24x32xf32>
    %75 = tpu.matmul %72, %74, %cst_51 {dimension_numbers = #tpu.dot_dimension_numbers<[1], [0], [0], [1], [0, 0, 1, 1], [], []>} : vector<24x24xf32>, vector<24x32xf32>, vector<24x32xf32> -> vector<24x32xf32>
    %76 = arith.addf %57, %75 : vector<24x32xf32>
    %77 = vector.extract_strided_slice %37 {offsets = [0, 16], sizes = [24, 8], strides = [1, 1]} : vector<24x96xf32> to vector<24x8xf32>
    %78 = vector.extract_strided_slice %37 {offsets = [0, 48], sizes = [24, 8], strides = [1, 1]} : vector<24x96xf32> to vector<24x8xf32>
    %79 = vector.extract_strided_slice %37 {offsets = [0, 80], sizes = [24, 8], strides = [1, 1]} : vector<24x96xf32> to vector<24x8xf32>
    %cst_52 = arith.constant dense<0.000000e+00> : vector<24x24xf32>
    %80 = tpu.matmul %77, %78, %cst_52 {dimension_numbers = #tpu.dot_dimension_numbers<[1], [1], [0], [0], [0, 0, 1, 0], [], []>} : vector<24x8xf32>, vector<24x8xf32>, vector<24x24xf32> -> vector<24x24xf32>
    %81 = arith.addf %80, %34 : vector<24x24xf32>
    %cst_53 = arith.constant dense<0xFF800000> : vector<24xf32>
    %82 = vector.multi_reduction <maximumf>, %81, %cst_53 [1] : vector<24x24xf32> to vector<24xf32>
    %83 = vector.shape_cast %82 : vector<24xf32> to vector<24x1xf32>
    %84 = vector.broadcast %83 : vector<24x1xf32> to vector<24x24xf32>
    %85 = arith.subf %81, %84 : vector<24x24xf32>
    %86 = math.exp %85 : vector<24x24xf32>
    %cst_54 = arith.constant dense<0.000000e+00> : vector<24xf32>
    %87 = vector.multi_reduction <add>, %86, %cst_54 [1] : vector<24x24xf32> to vector<24xf32>
    %88 = vector.shape_cast %87 : vector<24xf32> to vector<24x1xf32>
    %89 = tpu.reciprocal %88 : vector<24x1xf32> -> vector<24x1xf32>
    %90 = vector.broadcast %89 : vector<24x1xf32> to vector<24x24xf32>
    %91 = arith.mulf %86, %90 : vector<24x24xf32>
    %92 = vector.extract_strided_slice %10 {offsets = [16, 0], sizes = [8, 32], strides = [1, 1]} : vector<32x32xf32> to vector<8x32xf32>
    %cst_55 = arith.constant dense<0.000000e+00> : vector<24x32xf32>
    %93 = tpu.matmul %79, %92, %cst_55 {dimension_numbers = #tpu.dot_dimension_numbers<[1], [0], [0], [1], [0, 0, 1, 1], [], []>} : vector<24x8xf32>, vector<8x32xf32>, vector<24x32xf32> -> vector<24x32xf32>
    %cst_56 = arith.constant dense<0.000000e+00> : vector<24x32xf32>
    %94 = tpu.matmul %91, %93, %cst_56 {dimension_numbers = #tpu.dot_dimension_numbers<[1], [0], [0], [1], [0, 0, 1, 1], [], []>} : vector<24x24xf32>, vector<24x32xf32>, vector<24x32xf32> -> vector<24x32xf32>
    %95 = arith.addf %76, %94 : vector<24x32xf32>
    %96 = vector.extract_strided_slice %37 {offsets = [0, 24], sizes = [24, 8], strides = [1, 1]} : vector<24x96xf32> to vector<24x8xf32>
    %97 = vector.extract_strided_slice %37 {offsets = [0, 56], sizes = [24, 8], strides = [1, 1]} : vector<24x96xf32> to vector<24x8xf32>
    %98 = vector.extract_strided_slice %37 {offsets = [0, 88], sizes = [24, 8], strides = [1, 1]} : vector<24x96xf32> to vector<24x8xf32>
    %cst_57 = arith.constant dense<0.000000e+00> : vector<24x24xf32>
    %99 = tpu.matmul %96, %97, %cst_57 {dimension_numbers = #tpu.dot_dimension_numbers<[1], [1], [0], [0], [0, 0, 1, 0], [], []>} : vector<24x8xf32>, vector<24x8xf32>, vector<24x24xf32> -> vector<24x24xf32>
    %100 = arith.addf %99, %34 : vector<24x24xf32>
    %cst_58 = arith.constant dense<0xFF800000> : vector<24xf32>
    %101 = vector.multi_reduction <maximumf>, %100, %cst_58 [1] : vector<24x24xf32> to vector<24xf32>
    %102 = vector.shape_cast %101 : vector<24xf32> to vector<24x1xf32>
    %103 = vector.broadcast %102 : vector<24x1xf32> to vector<24x24xf32>
    %104 = arith.subf %100, %103 : vector<24x24xf32>
    %105 = math.exp %104 : vector<24x24xf32>
    %cst_59 = arith.constant dense<0.000000e+00> : vector<24xf32>
    %106 = vector.multi_reduction <add>, %105, %cst_59 [1] : vector<24x24xf32> to vector<24xf32>
    %107 = vector.shape_cast %106 : vector<24xf32> to vector<24x1xf32>
    %108 = tpu.reciprocal %107 : vector<24x1xf32> -> vector<24x1xf32>
    %109 = vector.broadcast %108 : vector<24x1xf32> to vector<24x24xf32>
    %110 = arith.mulf %105, %109 : vector<24x24xf32>
    %111 = vector.extract_strided_slice %10 {offsets = [24, 0], sizes = [8, 32], strides = [1, 1]} : vector<32x32xf32> to vector<8x32xf32>
    %cst_60 = arith.constant dense<0.000000e+00> : vector<24x32xf32>
    %112 = tpu.matmul %98, %111, %cst_60 {dimension_numbers = #tpu.dot_dimension_numbers<[1], [0], [0], [1], [0, 0, 1, 1], [], []>} : vector<24x8xf32>, vector<8x32xf32>, vector<24x32xf32> -> vector<24x32xf32>
    %cst_61 = arith.constant dense<0.000000e+00> : vector<24x32xf32>
    %113 = tpu.matmul %110, %112, %cst_61 {dimension_numbers = #tpu.dot_dimension_numbers<[1], [0], [0], [1], [0, 0, 1, 1], [], []>} : vector<24x24xf32>, vector<24x32xf32>, vector<24x32xf32> -> vector<24x32xf32>
    %114 = arith.addf %95, %113 : vector<24x32xf32>
    %115 = vector.broadcast %12 : vector<1x32xf32> to vector<24x32xf32>
    %116 = arith.addf %114, %115 : vector<24x32xf32>
    %117 = arith.addf %4, %116 : vector<24x32xf32>
    %cst_62 = arith.constant dense<0.000000e+00> : vector<24xf32>
    %118 = vector.multi_reduction <add>, %117, %cst_62 [1] : vector<24x32xf32> to vector<24xf32>
    %119 = vector.shape_cast %118 : vector<24xf32> to vector<24x1xf32>
    %cst_63 = arith.constant 3.200000e+01 : f32
    %120 = vector.broadcast %cst_63 : f32 to vector<24x1xf32>
    %121 = arith.divf %119, %120 : vector<24x1xf32>
    %122 = vector.broadcast %121 : vector<24x1xf32> to vector<24x32xf32>
    %123 = arith.subf %117, %122 : vector<24x32xf32>
    %124 = vector.broadcast %121 : vector<24x1xf32> to vector<24x32xf32>
    %125 = arith.subf %117, %124 : vector<24x32xf32>
    %126 = arith.mulf %123, %125 : vector<24x32xf32>
    %cst_64 = arith.constant dense<0.000000e+00> : vector<24xf32>
    %127 = vector.multi_reduction <add>, %126, %cst_64 [1] : vector<24x32xf32> to vector<24xf32>
    %128 = vector.shape_cast %127 : vector<24xf32> to vector<24x1xf32>
    %cst_65 = arith.constant 3.200000e+01 : f32
    %129 = vector.broadcast %cst_65 : f32 to vector<24x1xf32>
    %130 = arith.divf %128, %129 : vector<24x1xf32>
    %131 = vector.broadcast %121 : vector<24x1xf32> to vector<24x32xf32>
    %132 = arith.subf %117, %131 : vector<24x32xf32>
    %cst_66 = arith.constant 9.99999974E-6 : f32
    %133 = vector.broadcast %cst_66 : f32 to vector<24x1xf32>
    %134 = arith.addf %130, %133 : vector<24x1xf32>
    %135 = math.rsqrt %134 : vector<24x1xf32>
    %136 = vector.broadcast %135 : vector<24x1xf32> to vector<24x32xf32>
    %137 = arith.mulf %132, %136 : vector<24x32xf32>
    %138 = vector.broadcast %22 : vector<1x32xf32> to vector<24x32xf32>
    %139 = arith.mulf %137, %138 : vector<24x32xf32>
    %140 = vector.broadcast %24 : vector<1x32xf32> to vector<24x32xf32>
    %141 = arith.addf %139, %140 : vector<24x32xf32>
    %cst_67 = arith.constant dense<0.000000e+00> : vector<24x64xf32>
    %142 = tpu.matmul %141, %14, %cst_67 {dimension_numbers = #tpu.dot_dimension_numbers<[1], [0], [0], [1], [0, 0, 1, 1], [], []>} : vector<24x32xf32>, vector<32x64xf32>, vector<24x64xf32> -> vector<24x64xf32>
    %143 = vector.broadcast %16 : vector<1x64xf32> to vector<24x64xf32>
    %144 = arith.addf %142, %143 : vector<24x64xf32>
    %cst_68 = arith.constant 0.000000e+00 : f32
    %145 = vector.broadcast %cst_68 : f32 to vector<24x64xf32>
    %146 = arith.maximumf %144, %145 : vector<24x64xf32>
    %cst_69 = arith.constant dense<0.000000e+00> : vector<24x32xf32>
    %147 = tpu.matmul %146, %18, %cst_69 {dimension_numbers = #tpu.dot_dimension_numbers<[1], [0], [0], [1], [0, 0, 1, 1], [], []>} : vector<24x64xf32>, vector<64x32xf32>, vector<24x32xf32> -> vector<24x32xf32>
    %148 = vector.broadcast %20 : vector<1x32xf32> to vector<24x32xf32>
    %149 = arith.addf %147, %148 : vector<24x32xf32>
    %150 = arith.addf %141, %149 : vector<24x32xf32>
    %cst_70 = arith.constant dense<0.000000e+00> : vector<24xf32>
    %151 = vector.multi_reduction <add>, %150, %cst_70 [1] : vector<24x32xf32> to vector<24xf32>
    %152 = vector.shape_cast %151 : vector<24xf32> to vector<24x1xf32>
    %cst_71 = arith.constant 3.200000e+01 : f32
    %153 = vector.broadcast %cst_71 : f32 to vector<24x1xf32>
    %154 = arith.divf %152, %153 : vector<24x1xf32>
    %155 = vector.broadcast %154 : vector<24x1xf32> to vector<24x32xf32>
    %156 = arith.subf %150, %155 : vector<24x32xf32>
    %157 = vector.broadcast %154 : vector<24x1xf32> to vector<24x32xf32>
    %158 = arith.subf %150, %157 : vector<24x32xf32>
    %159 = arith.mulf %156, %158 : vector<24x32xf32>
    %cst_72 = arith.constant dense<0.000000e+00> : vector<24xf32>
    %160 = vector.multi_reduction <add>, %159, %cst_72 [1] : vector<24x32xf32> to vector<24xf32>
    %161 = vector.shape_cast %160 : vector<24xf32> to vector<24x1xf32>
    %cst_73 = arith.constant 3.200000e+01 : f32
    %162 = vector.broadcast %cst_73 : f32 to vector<24x1xf32>
    %163 = arith.divf %161, %162 : vector<24x1xf32>
    %164 = vector.broadcast %154 : vector<24x1xf32> to vector<24x32xf32>
    %165 = arith.subf %150, %164 : vector<24x32xf32>
    %cst_74 = arith.constant 9.99999974E-6 : f32
    %166 = vector.broadcast %cst_74 : f32 to vector<24x1xf32>
    %167 = arith.addf %163, %166 : vector<24x1xf32>
    %168 = math.rsqrt %167 : vector<24x1xf32>
    %169 = vector.broadcast %168 : vector<24x1xf32> to vector<24x32xf32>
    %170 = arith.mulf %165, %169 : vector<24x32xf32>
    %171 = vector.broadcast %26 : vector<1x32xf32> to vector<24x32xf32>
    %172 = arith.mulf %170, %171 : vector<24x32xf32>
    %173 = vector.broadcast %28 : vector<1x32xf32> to vector<24x32xf32>
    %174 = arith.addf %172, %173 : vector<24x32xf32>
    %c0_75 = arith.constant 0 : index
    %c0_76 = arith.constant 0 : index
    %c0_77 = arith.constant 0 : index
    %175 = vector.load %arg19[%c0_75, %c0_76, %c0_77] : memref<1x24x32xf32, #tpu.memory_space<vmem>>, vector<1x24x32xf32>
    %176 = vector.shape_cast %175 : vector<1x24x32xf32> to vector<24x32xf32>
    %177 = vector.shape_cast %174 : vector<24x32xf32> to vector<1x24x32xf32>
    tpu.vector_store %arg19[%c0_75, %c0_76, %c0_77], %177 {strides = array<i32>} : memref<1x24x32xf32, #tpu.memory_space<vmem>>, vector<1x24x32xf32>,
    return
  }
  func.func @transform_0(%arg0: i32, %arg1: i32) -> (i32, i32, i32) {
    %c0_i32 = arith.constant 0 : i32
    %c0_i32_0 = arith.constant 0 : i32
    %c0_i32_1 = arith.constant 0 : i32
    return %arg0, %c0_i32, %c0_i32_0 : i32, i32, i32
  }
  func.func @transform_1(%arg0: i32, %arg1: i32) -> (i32, i32) {
    %c0_i32 = arith.constant 0 : i32
    %c0_i32_0 = arith.constant 0 : i32
    %c0_i32_1 = arith.constant 0 : i32
    return %c0_i32, %c0_i32_0 : i32, i32
  }
  func.func @transform_2(%arg0: i32, %arg1: i32) -> (i32, i32) {
    %c0_i32 = arith.constant 0 : i32
    %c0_i32_0 = arith.constant 0 : i32
    %c0_i32_1 = arith.constant 0 : i32
    return %c0_i32, %c0_i32_0 : i32, i32
  }
  func.func @transform_3(%arg0: i32, %arg1: i32) -> (i32, i32) {
    %c0_i32 = arith.constant 0 : i32
    %c0_i32_0 = arith.constant 0 : i32
    %c0_i32_1 = arith.constant 0 : i32
    return %c0_i32, %c0_i32_0 : i32, i32
  }
  func.func @transform_4(%arg0: i32, %arg1: i32) -> (i32, i32) {
    %c0_i32 = arith.constant 0 : i32
    %c0_i32_0 = arith.constant 0 : i32
    %c0_i32_1 = arith.constant 0 : i32
    return %c0_i32, %c0_i32_0 : i32, i32
  }
  func.func @transform_5(%arg0: i32, %arg1: i32) -> (i32, i32, i32) {
    %c0_i32 = arith.constant 0 : i32
    %c0_i32_0 = arith.constant 0 : i32
    %c0_i32_1 = arith.constant 0 : i32
    return %arg1, %c0_i32, %c0_i32_0 : i32, i32, i32
  }
  func.func @transform_6(%arg0: i32, %arg1: i32) -> (i32, i32, i32) {
    %c0_i32 = arith.constant 0 : i32
    %c0_i32_0 = arith.constant 0 : i32
    %c0_i32_1 = arith.constant 0 : i32
    return %arg1, %c0_i32, %c0_i32_0 : i32, i32, i32
  }
  func.func @transform_7(%arg0: i32, %arg1: i32) -> (i32, i32, i32) {
    %c0_i32 = arith.constant 0 : i32
    %c0_i32_0 = arith.constant 0 : i32
    %c0_i32_1 = arith.constant 0 : i32
    return %arg1, %c0_i32, %c0_i32_0 : i32, i32, i32
  }
  func.func @transform_8(%arg0: i32, %arg1: i32) -> (i32, i32, i32) {
    %c0_i32 = arith.constant 0 : i32
    %c0_i32_0 = arith.constant 0 : i32
    %c0_i32_1 = arith.constant 0 : i32
    return %arg1, %c0_i32, %c0_i32_0 : i32, i32, i32
  }
  func.func @transform_9(%arg0: i32, %arg1: i32) -> (i32, i32, i32) {
    %c0_i32 = arith.constant 0 : i32
    %c0_i32_0 = arith.constant 0 : i32
    %c0_i32_1 = arith.constant 0 : i32
    return %arg1, %c0_i32, %c0_i32_0 : i32, i32, i32
  }
  func.func @transform_10(%arg0: i32, %arg1: i32) -> (i32, i32, i32) {
    %c0_i32 = arith.constant 0 : i32
    %c0_i32_0 = arith.constant 0 : i32
    %c0_i32_1 = arith.constant 0 : i32
    return %arg1, %c0_i32, %c0_i32_0 : i32, i32, i32
  }
  func.func @transform_11(%arg0: i32, %arg1: i32) -> (i32, i32, i32) {
    %c0_i32 = arith.constant 0 : i32
    %c0_i32_0 = arith.constant 0 : i32
    %c0_i32_1 = arith.constant 0 : i32
    return %arg1, %c0_i32, %c0_i32_0 : i32, i32, i32
  }
  func.func @transform_12(%arg0: i32, %arg1: i32) -> (i32, i32, i32) {
    %c0_i32 = arith.constant 0 : i32
    %c0_i32_0 = arith.constant 0 : i32
    %c0_i32_1 = arith.constant 0 : i32
    return %arg1, %c0_i32, %c0_i32_0 : i32, i32, i32
  }
  func.func @transform_13(%arg0: i32, %arg1: i32) -> (i32, i32, i32) {
    %c0_i32 = arith.constant 0 : i32
    %c0_i32_0 = arith.constant 0 : i32
    %c0_i32_1 = arith.constant 0 : i32
    return %arg1, %c0_i32, %c0_i32_0 : i32, i32, i32
  }
  func.func @transform_14(%arg0: i32, %arg1: i32) -> (i32, i32, i32) {
    %c0_i32 = arith.constant 0 : i32
    %c0_i32_0 = arith.constant 0 : i32
    %c0_i32_1 = arith.constant 0 : i32
    return %arg1, %c0_i32, %c0_i32_0 : i32, i32, i32
  }
  func.func @transform_15(%arg0: i32, %arg1: i32) -> (i32, i32, i32) {
    %c0_i32 = arith.constant 0 : i32
    %c0_i32_0 = arith.constant 0 : i32
    %c0_i32_1 = arith.constant 0 : i32
    return %arg1, %c0_i32, %c0_i32_0 : i32, i32, i32
  }
  func.func @transform_16(%arg0: i32, %arg1: i32) -> (i32, i32, i32) {
    %c0_i32 = arith.constant 0 : i32
    %c0_i32_0 = arith.constant 0 : i32
    %c0_i32_1 = arith.constant 0 : i32
    return %arg1, %c0_i32, %c0_i32_0 : i32, i32, i32
  }
  func.func @transform_17(%arg0: i32, %arg1: i32) -> (i32, i32, i32) {
    %c0_i32 = arith.constant 0 : i32
    %c0_i32_0 = arith.constant 0 : i32
    %c0_i32_1 = arith.constant 0 : i32
    return %arg0, %c0_i32, %c0_i32_0 : i32, i32, i32
  }
}

</mosaic_0001>

<bundles_post_ra>
// kernel: vit_forward.1
= control target key start
LH: loop header
LB: loop body
LE: loop exit
PB: predicated region body
PF: predicated region fallthrough
CT: control target
= control target key end

     0   :  { %s3589_s24 = smov 0   ;;  %s3591_s25 = smov 0   ;;  %s4129_s0 = inlined_call_operand.vmem [shape: f32[2,16,64], index: 0, kind: input, shape index: {}]   ;;  %s4130_s1 = inlined_call_operand.vmem [shape: f32[64,32], index: 1, kind: input, shape index: {}]   ;;  %s4131_s2 = inlined_call_operand.vmem [shape: f32[1,32], index: 2, kind: input, shape index: {}]   ;;  %s4132_s3 = inlined_call_operand.vmem [shape: f32[1,32], index: 3, kind: input, shape index: {}]   ;;  %s4133_s4 = inlined_call_operand.vmem [shape: f32[24,32], index: 4, kind: input, shape index: {}]   ;;  %s4134_s5 = inlined_call_operand.vmem [shape: f32[2,32,96], index: 5, kind: input, shape index: {}]   ;;  %s4135_s6 = inlined_call_operand.vmem [shape: f32[2,1,96], index: 6, kind: input, shape index: {}]   ;;  %s4136_s7 = inlined_call_operand.vmem [shape: f32[2,32,32], index: 7, kind: input, shape index: {}]   ;;  %s4137_s8 = inlined_call_operand.vmem [shape: f32[2,1,32], index: 8, kind: input, shape index: {}]   ;;  %s4138_s9 = inlined_call_operand.vmem [shape: f32[2,32,64], index: 9, kind: input, shape index: {}]   ;;  %s4139_s10 = inlined_call_operand.vmem [shape: f32[2,1,64], index: 10, kind: input, shape index: {}]   ;;  %s4140_s11 = inlined_call_operand.vmem [shape: f32[2,64,32], index: 11, kind: input, shape index: {}]   ;;  %s4141_s12 = inlined_call_operand.vmem [shape: f32[2,1,32], index: 12, kind: input, shape index: {}]   ;;  %s4142_s13 = inlined_call_operand.vmem [shape: f32[2,1,32], index: 13, kind: input, shape index: {}]   ;;  %s4143_s14 = inlined_call_operand.vmem [shape: f32[2,1,32], index: 14, kind: input, shape index: {}]   ;;  %s4144_s15 = inlined_call_operand.vmem [shape: f32[2,1,32], index: 15, kind: input, shape index: {}]   ;;  %s4145_s16 = inlined_call_operand.vmem [shape: f32[2,1,32], index: 16, kind: input, shape index: {}]   ;;  %s4146_s17 = inlined_call_operand.vmem [shape: f32[2,24,32], index: 17, kind: output, shape index: {}]  }
   0x1   :  { %4153 = sst [smem:[#allocation8_spill]] %s4129_s0  ;;  %s3593_s26 = smov 0  }
   0x2   :  { %4154 = sst [smem:[#allocation9_spill]] %s4130_s1  ;;  %s3595_s27 = smov 0  }
   0x3   :  { %4155 = sst [smem:[#allocation10_spill]] %s4131_s2  ;;  %s3597_s28 = smov 0  }
   0x4   :  { %4156 = sst [smem:[#allocation11_spill]] %s4132_s3 }
   0x5   :  { %4157 = sst [smem:[#allocation12_spill]] %s4133_s4 }
   0x6   :  { %4158 = sst [smem:[#allocation13_spill]] %s4134_s5 }
   0x7   :  { %4159 = sst [smem:[#allocation14_spill]] %s4135_s6 }
   0x8   :  { %4160 = sst [smem:[#allocation15_spill]] %s4136_s7 }
   0x9   :  { %4161 = sst [smem:[#allocation16_spill]] %s4138_s9 }
   0xa   :  { %4162 = sst [smem:[#allocation17_spill]] %s4140_s11 }
   0xb   :  { %4163 = sst [smem:[#allocation18_spill]] %s4146_s17 }
   0xc LB: > { %4164 = sst [smem:[#allocation2_spill]] %s3466_s24  ;;  %s36_s29 = sadd.s32 1, %s3474_s26  ;;  %s3482_s28 = sphi %s3597_s28, %s27_s28   ;;  %s3478_s27 = sphi %s3595_s27, %s4193_s27   ;;  %s3474_s26 = sphi %s3593_s26, %s4192_s26   ;;  %s3470_s25 = sphi %s3591_s25, %s4191_s25   ;;  %s3466_s24 = sphi %s3589_s24, %s4190_s24  }
   0xd   : > { %4165 = sst [smem:[#allocation3_spill]] %s3474_s26  ;;  %s39_s0 = sadd.s32 1, %s3478_s27 }
   0xe   : > { %4166 = sst [smem:[#allocation4_spill]] %s3478_s27  ;;  %p37_p0 = scmp.ge.s32.totalorder %s36_s29, 2 }
   0xf   : > { %4167 = sst [smem:[#allocation5_spill]] %s3482_s28  ;;  %p2803_p1 = scmp.ge.s32.totalorder %s3482_s28, 1 }
  0x10   : > { %p603_p2 = scmp.lt.s32.totalorder %s3482_s28, 5  ;;  %s4195_s29 = smov (%p37_p0, %s36_s29), 0 }
  0x11   : > { %4168 = sst [smem:[#allocation6_spill]] %s4195_s29  ;;  %s4197_s0 = smov (!%p37_p0, %s39_s0), %s3478_s27 }
  0x12   : > { %p604_p3 = pnand %p2803_p1, %p603_p2  ;;  %p41_p4 = scmp.ge.s32.totalorder %s4197_s0, 2 }
  0x13   : > { %p699_p5 = scmp.lt.s32.totalorder (!%p604_p3), %s3470_s25, 1  ;;  %p704_p6 = scmp.lt.s32.totalorder (!%p604_p3), %s3466_s24, 1 }
  0x14   : > { %s4199_s0 = smov (%p41_p4, %s4197_s0), 0  ;;  %607 = sbr.rel (%p604_p3) target bundleno = 3295 (0xcdf), region = 88 }
  0x15   : > { %4169 = sst [smem:[#allocation7_spill]] %s4199_s0  ;;  %s4170_s21 = sld [smem:[#allocation8_spill]] (!%p604_p3) }
  0x16   : > { %s4171_s5 = sld [smem:[#allocation13_spill]] (!%p604_p3)  ;;  %s4173_s7 = sld [smem:[#allocation15_spill]] (!%p604_p3) }
  0x17   : > { %s4174_s9 = sld [smem:[#allocation16_spill]] (!%p604_p3)  ;;  %s4175_s11 = sld [smem:[#allocation17_spill]] (!%p604_p3) }
  0x1b   : > { %s4201_s25 = smov (!%p699_p5, %s3470_s25), 1 }
  0x1c   : > { %s3623_s30 = scalar_select %p704_p6, %s3466_s24, 1 }
  0x1d   : > { %s2886_s18 = sshll.u32 %s4201_s25, 4  ;;  %s3308_s19 = smul.u32 24, %s4201_s25 }
  0x1e   : > { %s3628_s22 = scalar_lea.vmem %s4170_s21, %s2886_s18  ;;  %s2887_s23 = sshll.u32 %s3623_s30, 5 }
  0x1f   : > { %s3634_s27 = scalar_lea.vmem %s4171_s5, %s2887_s23  ;;  %s3643_s24 = scalar_lea.vmem %s4173_s7, %s2887_s23 }
  0x20   : > { %s3652_s21 = scalar_lea.vmem %s4174_s9, %s2887_s23  ;;  %s2890_s26 = sshll.u32 %s3623_s30, 6 }
  0x21   : > { %s3666_s6 = scalar_lea.vmem %s4175_s11, %s2890_s26  ;;  %s738_s1 = scalar_lea.vmem %s4142_s13, %s3623_s30 }
  0x22   : > { %s741_s18 = scalar_lea.vmem %s4143_s14, %s3623_s30  ;;  %s744_s5 = scalar_lea.vmem %s4144_s15, %s3623_s30 }
  0x23   : > { %s747_s28 = scalar_lea.vmem %s4145_s16, %s3623_s30  ;;  %s4176_s26 = sld [smem:[#allocation18_spill]] }
  0x24   : > { %s4177_s11 = sld [smem:[#allocation2_spill]] }
  0x29   : > { %s3687_s4 = scalar_lea.vmem %s4176_s26, %s3308_s19 }
  0x2a   : > { %p2815_p7 = scmp.ne.s32.totalorder %s4177_s11, 0 }
  0x2b   : > { %s4178_s23 = sld [smem:[#allocation9_spill]] (!%p2815_p7)  ;;  %vm774_vm0 = vcmask (!%p2815_p7), 523264   ;;  %v757_v8 = vld [vmem:[%s3628_s22] sm:$0xff] (!%p2815_p7)  ;;  %v758_v13 = vld [vmem:[%s3628_s22 + $0x8] sm:$0xff] (!%p2815_p7)  ;;  %s4179_s19 = sld [smem:[#allocation10_spill]] (!%p2815_p7)  ;;  %vm859_vm1 = vcmask (!%p2815_p7), 1040384  }
  0x2c   : > { %756 = sbr.rel (%p2815_p7) target bundleno = 289 (0x121), region = 92  ;;  %3006 = vmatprep.mubr.msk.f32.mxu0 (!%p2815_p7), %vm774_vm0, %v757_v8  ;;  %s4180_s3 = sld [smem:[#allocation12_spill]] (!%p2815_p7)  ;;  %vm874_vm2 = vcmask (!%p2815_p7), 261120  }
  0x2d   : > { %s4181_s26 = sld [smem:[#allocation11_spill]] (!%p2815_p7) }
  0x31   : > { %v759_v0 = vld [vmem:[%s4178_s23] sm:$0xff] (!%p2815_p7)  ;;  %v760_v1 = vld [vmem:[%s4178_s23 + $0x8] sm:$0xff] (!%p2815_p7)  ;;  %v761_v2 = vld [vmem:[%s4178_s23 + $0x10] sm:$0xff] (!%p2815_p7) }
  0x32   : > { %v3232_v3 = vpack.c.bf16 (!%p2815_p7), %v760_v1, %v759_v0  ;;  %v762_v4 = vld [vmem:[%s4178_s23 + $0x18] sm:$0xff] (!%p2815_p7)  ;;  %v763_v6 = vld [vmem:[%s4178_s23 + $0x20] sm:$0xff] (!%p2815_p7)  ;;  %v764_v7 = vld [vmem:[%s4178_s23 + $0x28] sm:$0xff] (!%p2815_p7) }
  0x33   : > { %v3236_v5 = vpack.c.bf16 %v762_v4, %v761_v2  ;;  %v3240_v9 = vpack.c.bf16 %v764_v7, %v763_v6  ;;  %v765_v10 = vld [vmem:[%s4178_s23 + $0x30] sm:$0xff]  ;;  %v766_v11 = vld [vmem:[%s4178_s23 + $0x38] sm:$0xff]  ;;  %v2816_v14 = vld [vmem:[%s4179_s19] ss:$0 sm:$0xff] }
  0x34   : > { %3233 = vmatprep.subr.bf16.mxu0 %v3232_v3  ;;  %v3244_v12 = vpack.c.bf16 %v766_v11, %v765_v10  ;;  %v870_v20 = vld [vmem:[%s4180_s3 + $0x10] sm:$0xff]  ;;  %v856_v21 = vld [vmem:[%s4181_s26] sm:$0x1]  ;;  %v869_v24 = vld [vmem:[%s4180_s3 + $0x8] sm:$0xff] }
  0x35   : > { %3235 = vmatpush3.bf16.msra.mxu0 %v3232_v3  ;;  %v868_v23 = vld [vmem:[%s4180_s3] sm:$0xff] }
  0x36   : > { %3237 = vmatprep.subr.bf16.mxu0 %v3236_v5 }
  0x39   : > { %3239 = vmatpush3.bf16.msra.mxu0 %v3236_v5 }
  0x3a   : > { %3241 = vmatprep.subr.bf16.mxu0 %v3240_v9 }
  0x3d   : > { %3243 = vmatpush3.bf16.msra.mxu0 %v3240_v9 }
  0x3e   : > { %3245 = vmatprep.subr.bf16.mxu0 %v3244_v12 }
  0x41   : > { %3247 = vmatpush3.bf16.msra.mxu0 %v3244_v12 }
  0x44   : > { %3007 = vmatmul.mubr.msk.f32.vlgmr.msra.gmra.mrb[0].mxu0 %vm774_vm0, %v758_v13 }
 0x117   : > { %v3008_v15 = vpop.f32.mrb[0].mxu0 }
 0x118   : > { %v853_v16 = vadd.f32 %v3008_v15, %v2816_v14  ;;  %v847_v17 = vpop.f32.mrb[1].mxu0 }
 0x119   : > { %v848_v18 = vadd.f32 %v2816_v14, %v847_v17 }
 0x11a   : > { %v861_v19 = vrot.slane %v853_v16, 7 }
 0x11b   : > { %v860_v22 = vrot.slane %v848_v18, 7 }
 0x11c   : > { %v867_v25 = vsel %vm859_vm1, %v861_v19, 0.0 }
 0x11d   : > { %v873_v26 = vadd.f32 %v870_v20, %v867_v25  ;;  %v862_v27 = vsel %vm859_vm1, %v860_v22, %v861_v19  ;;  %v866_v28 = vsel %vm859_vm1, %v856_v21, %v860_v22 }
 0x11e   : > { %v871_v29 = vadd.f32 %v868_v23, %v866_v28  ;;  %v872_v30 = vadd.f32 %v869_v24, %v862_v27 }
 0x11f   : > { %877 = vst.msk [vmem:[%s3687_s4 + $0x10] sm:$0xff] %vm874_vm2, %v873_v26 }
 0x120   : > { %875 = vst.msk [vmem:[%s3687_s4] sm:$0xff] %vm874_vm2, %v871_v29  ;;  %876 = vst.msk [vmem:[%s3687_s4 + $0x8] sm:$0xff] %vm874_vm2, %v872_v30 }
 0x121 PF: > { %v881_v31 = vld [vmem:[%s3634_s27] sm:$0xff]  ;;  %v882_v32 = vld [vmem:[%s3634_s27 + $0x8] sm:$0xff]  ;;  %v883_v33 = vld [vmem:[%s3634_s27 + $0x10] sm:$0xff]  ;;  %v3484_v34 = vmov 0.0|0.0   ;;  %vm3485_vm3 = vmmov 0   ;;  %v3486_v37 = vmov 0.0   ;;  %v909_v13 = vlaneseq }
 0x122   : > { %3248 = vmatprep.subr.bf16.mxu1 %v3484_v34  ;;  %v3249_v35 = vpack.c.bf16 %v882_v32, %v881_v31  ;;  %v884_v36 = vld [vmem:[%s3634_s27 + $0x18] sm:$0xff]  ;;  %3017 = vmatprep.mubr.msk.f32.mxu1 %vm3485_vm3, %v3486_v37  ;;  %vm919_vm4 = vcmask 261120   ;;  %v886_v42 = vld [vmem:[%s3643_s24] sm:$0xff]  ;;  %s4182_s9 = sld [smem:[#allocation14_spill]]  ;;  %s3487_s2 = smov 64   ;;  %vm1018_vm5 = vcmask 64512  }
 0x123   : > { %3041 = vmatprep.subr.mxu0 %v3486_v37  ;;  %3043 = vmatprep.mubr.msk.f32.mxu0 %vm3485_vm3, %v3486_v37  ;;  %v3252_v38 = vpack.c.bf16 %v884_v36, %v883_v33  ;;  %s3488_s11 = smov 96   ;;  %s3489_s22 = smov 88   ;;  %vm3804_vm6 = vmpackc.low %vm1018_vm5, %vm1018_vm5  ;;  %v887_v6 = vld [vmem:[%s3643_s24 + $0x8] sm:$0xff]  ;;  %v910_v14 = vand.u32 127, %v909_v13  ;;  %v3492_v20 = vmov -1e+30  }
 0x124   : > { %3250 = vmatpush3.bf16.msra.mxu1 %v3249_v35  ;;  %3042 = vmatpush3.msra.mxu0 %v886_v42  ;;  %s3490_s7 = smov 120   ;;  %s3491_s26 = smov 56   ;;  %vm1111_vm8 = vcmask 195584   ;;  %vm2460_vm9 = vcmask 523264  }
 0x125   : > { %3251 = vmatprep.subr.bf16.mxu1 %v3484_v34  ;;  %3258 = vmatprep.subr.bf16.mxu0 %v3484_v34  ;;  %vm911_vm7 = vcmp.lt.s32.totalorder %v910_v14, 17  ;;  %s3493_s17 = smov 80   ;;  %s3494_s25 = smov 112  }
 0x126   : > { %v3763_v41 = vld [vmem:[%s3687_s4 + $0x10] sm:$0xff]  ;;  %v3862_v21 = vsel %vm911_vm7, 0.0, %v3492_v20  ;;  %s3495_s20 = smov 48   ;;  %s3496_s29 = smov 72  }
 0x127   : > { %v3748_v39 = vld [vmem:[%s3687_s4] sm:$0xff]  ;;  %v3756_v40 = vld [vmem:[%s3687_s4 + $0x8] sm:$0xff]  ;;  %s3497_s27 = smov 104   ;;  %s3498_s0 = smov 40  }
 0x128   : > { %3253 = vmatpush3.bf16.msra.mxu1 %v3252_v38  ;;  %s4183_s19 = scalar_lea.vmem %s4182_s9, %s3623_s30 }
 0x129   : > { %3254 = vmatprep.subr.bf16.mxu1 %v3484_v34  ;;  %v2819_v43 = vld [vmem:[%s4183_s19] ss:$0 sm:$0xff]  ;;  %s4186_s19 = scalar_lea.vmem %s4137_s8, %s3623_s30 }
 0x12b   : > { %3018 = vmatmul.mubr.msk.f32.vlgmr.msra.gmra.mrb[0].mxu1 %vm919_vm4, %v3748_v39 }
 0x12c   : > { %3020 = vmatprep.mubr.msk.f32.mxu1 %vm3485_vm3, %v3486_v37 }
 0x12f   : > { %3021 = vmatmul.mubr.msk.f32.gmra.mrb[2].mxu1 %vm919_vm4, %v3756_v40 }
 0x130   : > { %3023 = vmatprep.mubr.msk.f32.mxu1 %vm3485_vm3, %v3486_v37 }
 0x133   : > { %3024 = vmatmul.mubr.msk.f32.gmra.mrb[4].mxu1 %vm919_vm4, %v3763_v41 }
 0x134   : > { %3032 = vmatprep.mubr.msk.f32.mxu1 %vm3485_vm3, %v3486_v37 }
 0x1fe   : > { %v995_v44 = vpop.f32.mrb[0].mxu1 }
 0x1ff   : > { %v3776_v45 = vadd.f32 %v2819_v43, %v995_v44  ;;  %v3019_v46 = vpop.f32.mrb[1].mxu1 }
 0x201   : > { %1145 = vrot.lane.b32.xlu1 %v3776_v45, %s3487_s2 }
 0x202   : > { %v1000_v47 = vpop.f32.mrb[2].mxu1 }
 0x203   : > { %v3779_v48 = vadd.f32 %v2819_v43, %v1000_v47  ;;  %v3022_v49 = vpop.f32.mrb[3].mxu1 }
 0x205   : > { %v3783_v50 = vpack.i.bf16 %v3779_v48, %v3776_v45 }
 0x206   : > { %v1005_v51 = vpop.f32.mrb[4].mxu1 }
 0x207   : > { %v3785_v52 = vadd.f32 %v2819_v43, %v1005_v51  ;;  %3365 = vrot.lane.b32.xlu0 %v3783_v50, %s3488_s11  ;;  %v3025_v53 = vpop.f32.mrb[5].mxu1 }
 0x209   : > { %1016 = vrot.lane.b32.xlu1 %v3785_v52, %s3488_s11 }
 0x20b   : > { %3370 = vrot.lane.b32.xlu0 %v3783_v50, %s3489_s22 }
 0x20d   : > { %1149 = vrot.lane.b32.xlu1 %v3785_v52, %s3487_s2 }
 0x20f   : > { %1147 = vrot.lane.b32.xlu0 %v3779_v48, %s3487_s2 }
 0x211   : > { %1237 = vrot.lane.b32.xlu1 %v3776_v45, %s3490_s7 }
 0x213   : > { %1247 = vrot.lane.b32.xlu0 %v3785_v52, %s3489_s22 }
 0x215   : > { %1241 = vrot.lane.b32.xlu1 %v3785_v52, %s3490_s7 }
 0x217   : > { %1239 = vrot.lane.b32.xlu0 %v3779_v48, %s3490_s7  ;;  %s4187_s7 = scalar_lea.vmem %s4139_s10, %s3623_s30 }
 0x219   : > { %1376 = vrot.lane.b32.xlu1 %v3779_v48, %s3491_s26 }
 0x21b   : > { %1374 = vrot.lane.b32.xlu0 %v3776_v45, %s3491_s26 }
 0x21f   : > { %1378 = vrot.lane.b32.xlu0 %v3785_v52, %s3491_s26 }
 0x273   : > { %v1146_v54 = vpop.permute.xlu1 %1145 }
 0x274   : > { %3044 = vmatmul.mubr.msk.f32.vlgmr.msra.gmra.mrb[0].mxu0 %vm1018_vm5, %v1146_v54 }
 0x275   : > { %3046 = vmatprep.mubr.msk.f32.mxu0 %vm3485_vm3, %v3486_v37 }
 0x279   : > { %v3366_v55 = vpop.permute.xlu0 %3365 }
 0x27a   : > { %v3368_v56 = vunpack.i.h.bf16 %v3366_v55  ;;  %v3367_v57 = vunpack.i.l.bf16 %v3366_v55 }
 0x27b   : > { %v1017_v60 = vpop.permute.xlu1 %1016 }
 0x27c   : > { %v3255_v59 = vpack.c.bf16 %v3368_v56, %v3367_v57 }
 0x27d   : > { %v3371_v61 = vpop.permute.xlu0 %3370 }
 0x27e   : > { %v3373_v62 = vunpack.i.h.bf16 %v3371_v61  ;;  %v3372_v63 = vunpack.i.l.bf16 %v3371_v61  ;;  %3257 = vmatpush3.bf16.xpose.msk.msra.mxu1 %vm3804_vm6, %v3255_v59 }
 0x27f   : > { %3030 = vmatprep.subr.mxu1 %v3486_v37  ;;  %v1150_v2 = vpop.permute.xlu1 %1149 }
 0x280   : > { %v3259_v0 = vpack.c.bf16 %v3373_v62, %v3372_v63 }
 0x281   : > { %v1148_v1 = vpop.permute.xlu0 %1147 }
 0x282   : > { %3047 = vmatmul.mubr.msk.f32.gmra.mrb[2].mxu0 %vm1018_vm5, %v1148_v1 }
 0x283   : > { %3261 = vmatpush3.bf16.xpose.msk.msra.mxu0 %vm3804_vm6, %v3259_v0  ;;  %3049 = vmatprep.mubr.msk.f32.mxu0 %vm3485_vm3, %v3486_v37  ;;  %v1238_v4 = vpop.permute.xlu1 %1237 }
 0x284   : > { %3056 = vmatprep.subr.mxu0 %v3486_v37 }
 0x285   : > { %v1248_v3 = vpop.permute.xlu0 %1247 }
 0x286   : > { %3031 = vmatpush3.xpose.msk.msra.mxu1 %vm1018_vm5, %v1017_v60  ;;  %3050 = vmatmul.mubr.msk.f32.gmra.mrb[4].mxu0 %vm1018_vm5, %v1150_v2 }
 0x287   : > { %3300 = vmatprep.subr.bf16.mxu1 %v3484_v34  ;;  %3058 = vmatprep.mubr.msk.f32.mxu0 %vm3485_vm3, %v3486_v37  ;;  %v1242_v7 = vpop.permute.xlu1 %1241 }
 0x289   : > { %3033 = vmatmul.mubr.msk.f32.vlgmr.msra.gmra.mrb[6].mxu1 %vm1018_vm5, %v3776_v45  ;;  %v1240_v5 = vpop.permute.xlu0 %1239 }
 0x28a   : > { %3302 = vmatpush3.bf16.xpose.msk.msra.mxu1 %vm3804_vm6, %v3259_v0  ;;  %3035 = vmatprep.mubr.msk.f32.mxu1 %vm3485_vm3, %v3486_v37 }
 0x28b   : > { %3057 = vmatpush3.xpose.msk.msra.mxu0 %vm1018_vm5, %v1248_v3  ;;  %3301 = vmatprep.subr.mxu1 %v3486_v37  ;;  %v1377_v9 = vpop.permute.xlu1 %1376 }
 0x28c   : > { %3067 = vmatprep.subr.mxu0 %v3486_v37 }
 0x28d   : > { %3036 = vmatmul.mubr.msk.f32.gmra.mrb[8].mxu1 %vm1018_vm5, %v3779_v48  ;;  %v1375_v8 = vpop.permute.xlu0 %1374 }
 0x28e   : > { %3059 = vmatmul.mubr.msk.f32.vlgmr.msra.gmra.mrb[6].mxu0 %vm1018_vm5, %v1238_v4  ;;  %3038 = vmatprep.mubr.msk.f32.mxu1 %vm3485_vm3, %v3486_v37 }
 0x28f   : > { %3068 = vmatpush3.msra.mxu0 %v887_v6  ;;  %3069 = vmatprep.mubr.msk.f32.mxu0 %vm3485_vm3, %v3486_v37 }
 0x290   : > { %3265 = vmatprep.subr.bf16.mxu0 %v3484_v34 }
 0x291   : > { %3039 = vmatmul.mubr.msk.f32.gmra.mrb[10].mxu1 %vm1018_vm5, %v3785_v52  ;;  %v1379_v10 = vpop.permute.xlu0 %1378 }
 0x292   : > { %3070 = vmatmul.mubr.msk.f32.vlgmr.msra.gmra.mrb[8].mxu0 %vm1018_vm5, %v1375_v8  ;;  %3303 = vmatpush3.xpose.msk.msra.mxu1 %vm1018_vm5, %v1248_v3 }
 0x293   : > { %3061 = vmatprep.mubr.msk.f32.mxu1 %vm3485_vm3, %v3486_v37  ;;  %3072 = vmatprep.mubr.msk.f32.mxu0 %vm3485_vm3, %v3486_v37 }
 0x294   : > { %3262 = vmatprep.subr.bf16.mxu1 %v3484_v34 }
 0x295   : > { %3062 = vmatmul.mubr.msk.f32.vlgmr.msra.gmra.mrb[12].mxu1 %vm1018_vm5, %v1240_v5 }
 0x296   : > { %3073 = vmatmul.mubr.msk.f32.gmra.mrb[10].mxu0 %vm1018_vm5, %v1377_v9  ;;  %3064 = vmatprep.mubr.msk.f32.mxu1 %vm3485_vm3, %v3486_v37 }
 0x297   : > { %3075 = vmatprep.mubr.msk.f32.mxu0 %vm3485_vm3, %v3486_v37 }
 0x299   : > { %3065 = vmatmul.mubr.msk.f32.gmra.mrb[14].mxu1 %vm1018_vm5, %v1242_v7 }
 0x29a   : > { %3076 = vmatmul.mubr.msk.f32.gmra.mrb[12].mxu0 %vm1018_vm5, %v1379_v10  ;;  %3084 = vmatprep.mubr.msk.f32.mxu1 %vm3485_vm3, %v3486_v37 }
 0x29b   : > { %3099 = vmatprep.mubr.msk.f32.mxu0 %vm3485_vm3, %v3486_v37 }
 0x347   : > { %v1223_v11 = vpop.f32.mrb[0].mxu0 }
 0x348   : > { %v3045_v12 = vpop.f32.mrb[1].mxu0 }
 0x355   : > { %v1228_v15 = vpop.f32.mrb[2].mxu0 }
 0x356   : > { %v3266_v16 = vpack.c.bf16 %v1228_v15, %v1223_v11  ;;  %v3048_v17 = vpop.f32.mrb[3].mxu0 }
 0x358   : > { %3267 = vmatpush3.bf16.msra.mxu0 %v3266_v16 }
 0x359   : > { %v1233_v18 = vpop.f32.mrb[4].mxu0  ;;  %3097 = vmatprep.subr.mxu0 %v3486_v37 }
 0x35a   : > { %v3051_v19 = vpop.f32.mrb[5].mxu0 }
 0x35c   : > { %v1097_v22 = vpop.f32.mrb[6].mxu1  ;;  %3098 = vmatpush3.msra.mxu0 %v1233_v18 }
 0x35d   : > { %v1098_v23 = vadd.f32 %v1097_v22, %v3862_v21  ;;  %v3034_v24 = vpop.f32.mrb[7].mxu1  ;;  %3268 = vmatprep.subr.bf16.mxu0 %v3484_v34 }
 0x35f   : > { %v1112_v25 = vsel %vm1111_vm8, %v1098_v23, -inf }
 0x360   : > { %1113 = vmax.xlane.f32.xlu1 %v1112_v25  ;;  %v1102_v26 = vpop.f32.mrb[8].mxu1 }
 0x361   : > { %v1327_v27 = vpop.f32.mrb[6].mxu0  ;;  %v3037_v28 = vpop.f32.mrb[9].mxu1  ;;  %v1103_v31 = vadd.f32 %v1102_v26, %v3862_v21 }
 0x362   : > { %v1328_v29 = vadd.f32 %v1327_v27, %v3862_v21  ;;  %v3060_v30 = vpop.f32.mrb[7].mxu0 }
 0x363   : > { %v1115_v44 = vsel %vm1111_vm8, %v1103_v31, -inf }
 0x364   : > { %v1341_v32 = vsel %vm1111_vm8, %v1328_v29, -inf  ;;  %v1107_v33 = vpop.f32.mrb[10].mxu1 }
 0x365   : > { %1342 = vmax.xlane.f32.xlu0 %v1341_v32  ;;  %v1108_v35 = vadd.f32 %v1107_v33, %v3862_v21  ;;  %v1452_v36 = vpop.f32.mrb[8].mxu0  ;;  %v3040_v38 = vpop.f32.mrb[11].mxu1 }
 0x366   : > { %v3071_v42 = vpop.f32.mrb[9].mxu0 }
 0x367   : > { %v1118_v43 = vsel %vm1111_vm8, %v1108_v35, -inf }
 0x368   : > { %1119 = vmax.xlane.f32.xlu1 %v1118_v43  ;;  %v1332_v46 = vpop.f32.mrb[12].mxu1 }
 0x369   : > { %v1457_v47 = vpop.f32.mrb[10].mxu0  ;;  %1116 = vmax.xlane.f32.xlu0 %v1115_v44  ;;  %v1333_v49 = vadd.f32 %v1332_v46, %v3862_v21  ;;  %v3063_v51 = vpop.f32.mrb[13].mxu1 }
 0x36a   : > { %v3263_v53 = vpack.c.bf16 %v1457_v47, %v1452_v36  ;;  %v3074_v54 = vpop.f32.mrb[11].mxu0 }
 0x36b   : > { %v1344_v55 = vsel %vm1111_vm8, %v1333_v49, -inf }
 0x36c   : > { %3264 = vmatpush3.bf16.msra.mxu1 %v3263_v53  ;;  %v1337_v56 = vpop.f32.mrb[14].mxu1 }
 0x36d   : > { %v1462_v57 = vpop.f32.mrb[12].mxu0  ;;  %1345 = vmax.xlane.f32.xlu0 %v1344_v55  ;;  %v1338_v59 = vadd.f32 %v1337_v56, %v3862_v21  ;;  %v3066_v60 = vpop.f32.mrb[15].mxu1  ;;  %3082 = vmatprep.subr.mxu1 %v3486_v37 }
 0x36e   : > { %v3077_v61 = vpop.f32.mrb[13].mxu0  ;;  %v888_v60 = vld [vmem:[%s3643_s24 + $0x10] sm:$0xff] }
 0x36f   : > { %v1347_v62 = vsel %vm1111_vm8, %v1338_v59, -inf }
 0x370   : > { %3083 = vmatpush3.msra.mxu1 %v1462_v57  ;;  %1348 = vmax.xlane.f32.xlu1 %v1347_v62 }
 0x371   : > { %3304 = vmatprep.subr.bf16.mxu1 %v3484_v34 }
 0x3ed   : > { %v1114_v63 = vpop.xlane.xlu1 %1113 }
 0x3ee   : > { %v1121_v0 = vsub.f32 %v1098_v23, %v1114_v63 }
 0x3f0   : > { %v1124_v1 = vmul.f32 1.442695, %v1121_v0 }
 0x3f2   : > { %3384 = vpow2.f32 %v1124_v1  ;;  %v1343_v2 = vpop.xlane.xlu0 %1342 }
 0x3f3   : > { %v1350_v3 = vsub.f32 %v1328_v29, %v1343_v2 }
 0x3f5   : > { %v1353_v4 = vmul.f32 1.442695, %v1350_v3  ;;  %v1120_v5 = vpop.xlane.xlu1 %1119 }
 0x3f6   : > { %v1117_v6 = vpop.xlane.xlu0 %1116  ;;  %v1123_v7 = vsub.f32 %v1108_v35, %v1120_v5 }
 0x3f7   : > { %3386 = vpow2.f32 %v1353_v4  ;;  %v1122_v8 = vsub.f32 %v1103_v31, %v1117_v6 }
 0x3f8   : > { %v1128_v10 = vmul.f32 1.442695, %v1123_v7 }
 0x3f9   : > { %v1126_v9 = vmul.f32 1.442695, %v1122_v8 }
 0x3fa   : > { %v1346_v11 = vpop.xlane.xlu0 %1345 }
 0x3fb   : > { %3388 = vpow2.f32 %v1126_v9  ;;  %v1351_v12 = vsub.f32 %v1333_v49, %v1346_v11 }
 0x3fc   : > { %v3385_v13 = vpop.eup %3384  ;;  %3390 = vpow2.f32 %v1128_v10 }
 0x3fd   : > { %v1355_v14 = vmul.f32 1.442695, %v1351_v12  ;;  %v1130_v15 = vsel %vm1111_vm8, %v3385_v13, 0.0  ;;  %v1349_v25 = vpop.xlane.xlu1 %1348 }
 0x3fe   : > { %1131 = vadd.xlane.f32.xlu0 %v1130_v15  ;;  %v1352_v26 = vsub.f32 %v1338_v59, %v1349_v25 }
 0x3ff   : > { %3392 = vpow2.f32 %v1355_v14 }
 0x400   : > { %v1357_v27 = vmul.f32 1.442695, %v1352_v26 }
 0x401   : > { %v3387_v16 = vpop.eup %3386 }
 0x402   : > { %v1359_v17 = vsel %vm1111_vm8, %v3387_v16, 0.0  ;;  %3394 = vpow2.f32 %v1357_v27 }
 0x403   : > { %1360 = vadd.xlane.f32.xlu0 %v1359_v17 }
 0x405   : > { %v3389_v18 = vpop.eup %3388 }
 0x406   : > { %v1133_v19 = vsel %vm1111_vm8, %v3389_v18, 0.0  ;;  %v3882_v20 = vpop.eup %3390 }
 0x407   : > { %1134 = vadd.xlane.f32.xlu1 %v1133_v19  ;;  %v1136_v24 = vsel %vm1111_vm8, %v3882_v20, 0.0 }
 0x409   : > { %v3393_v22 = vpop.eup %3392 }
 0x40a   : > { %v1362_v23 = vsel %vm1111_vm8, %v3393_v22, 0.0 }
 0x40b   : > { %1363 = vadd.xlane.f32.xlu0 %v1362_v23  ;;  %1137 = vadd.xlane.f32.xlu1 %v1136_v24 }
 0x40c   : > { %v3895_v28 = vpop.eup %3394 }
 0x40d   : > { %v1365_v29 = vsel %vm1111_vm8, %v3895_v28, 0.0 }
 0x41c   : > { %1654 = vrot.lane.b32.xlu1 %v3785_v52, %s3493_s17 }
 0x420   : > { %1644 = vrot.lane.b32.xlu1 %v3776_v45, %s3494_s25 }
 0x421   : > { %3375 = vrot.lane.b32.xlu0 %v3783_v50, %s3493_s17  ;;  %s4188_s17 = scalar_lea.vmem %s4141_s12, %s3623_s30 }
 0x425   : > { %1646 = vrot.lane.b32.xlu0 %v3779_v48, %s3494_s25 }
 0x429   : > { %1781 = vrot.lane.b32.xlu0 %v3776_v45, %s3495_s20 }
 0x42d   : > { %1785 = vrot.lane.b32.xlu0 %v3785_v52, %s3495_s20 }
 0x431   : > { %1975 = vrot.lane.b32.xlu0 %v3785_v52, %s3496_s29 }
 0x435   : > { %1967 = vrot.lane.b32.xlu0 %v3779_v48, %s3497_s27 }
 0x444   : > { %1366 = vadd.xlane.f32.xlu1 %v1365_v29 }
 0x455   : > { %1648 = vrot.lane.b32.xlu1 %v3785_v52, %s3494_s25 }
 0x459   : > { %1783 = vrot.lane.b32.xlu1 %v3779_v48, %s3495_s20 }
 0x45d   : > { %3380 = vrot.lane.b32.xlu1 %v3783_v50, %s3496_s29 }
 0x461   : > { %1965 = vrot.lane.b32.xlu1 %v3776_v45, %s3497_s27 }
 0x465   : > { %1969 = vrot.lane.b32.xlu1 %v3785_v52, %s3497_s27 }
 0x48b   : > { %v1132_v30 = vpop.xlane.xlu0 %1131 }
 0x48c   : > { %3396 = vrcp.f32 %v1132_v30 }
 0x490   : > { %v1361_v31 = vpop.xlane.xlu0 %1360 }
 0x491   : > { %3398 = vrcp.f32 %v1361_v31 }
 0x494   : > { %v1135_v32 = vpop.xlane.xlu1 %1134 }
 0x495   : > { %3400 = vrcp.f32 %v1135_v32 }
 0x496   : > { %v3397_v33 = vpop.eup %3396 }
 0x497   : > { %v1142_v35 = vmul.f32 %v3397_v33, %v3385_v13 }
 0x498   : > { %v1364_v36 = vpop.xlane.xlu0 %1363  ;;  %v1138_v38 = vpop.xlane.xlu1 %1137 }
 0x499   : > { %3402 = vrcp.f32 %v1364_v36  ;;  %3100 = vmatmul.mubr.msk.f32.vlgmr.msra.gmra.mrb[14].mxu0 %vm1111_vm8, %v1142_v35 }
 0x49a   : > { %3404 = vrcp.f32 %v1138_v38  ;;  %3102 = vmatprep.mubr.msk.f32.mxu0 %vm3485_vm3, %v3486_v37 }
 0x49b   : > { %v3399_v50 = vpop.eup %3398 }
 0x49c   : > { %v1371_v42 = vmul.f32 %v3399_v50, %v3387_v16  ;;  %v3376_v43 = vpop.permute.xlu0 %3375  ;;  %v1655_v56 = vpop.permute.xlu1 %1654 }
 0x49d   : > { %v3378_v44 = vunpack.i.h.bf16 %v3376_v43  ;;  %v3377_v46 = vunpack.i.l.bf16 %v3376_v43 }
 0x49e   : > { %3085 = vmatmul.mubr.msk.f32.vlgmr.msra.gmra.mrb[16].mxu1 %vm1111_vm8, %v1371_v42 }
 0x49f   : > { %v3401_v47 = vpop.eup %3400  ;;  %v3269_v49 = vpack.c.bf16 %v3378_v44, %v3377_v46  ;;  %3087 = vmatprep.mubr.msk.f32.mxu1 %vm3485_vm3, %v3486_v37 }
 0x4a0   : > { %v1143_v51 = vmul.f32 %v3401_v47, %v3389_v18  ;;  %v1647_v59 = vpop.permute.xlu0 %1646  ;;  %v1645_v61 = vpop.permute.xlu1 %1644 }
 0x4a1   : > { %3271 = vmatpush3.bf16.xpose.msk.msra.mxu0 %vm3804_vm6, %v3269_v49  ;;  %3306 = vmatpush3.bf16.xpose.msk.msra.mxu1 %vm3804_vm6, %v3269_v49 }
 0x4a2   : > { %3103 = vmatmul.mubr.msk.f32.gmra.mrb[16].mxu0 %vm1111_vm8, %v1143_v51  ;;  %3112 = vmatprep.subr.mxu0 %v3486_v37 }
 0x4a3   : > { %v3403_v53 = vpop.eup %3402  ;;  %3105 = vmatprep.mubr.msk.f32.mxu0 %vm3485_vm3, %v3486_v37  ;;  %3305 = vmatprep.subr.mxu1 %v3486_v37 }
 0x4a4   : > { %v3405_v54 = vpop.eup %3404  ;;  %v1372_v55 = vmul.f32 %v3403_v53, %v3393_v22  ;;  %v1782_v62 = vpop.permute.xlu0 %1781 }
 0x4a5   : > { %v1144_v57 = vmul.f32 %v3405_v54, %v3882_v20 }
 0x4a6   : > { %3088 = vmatmul.mubr.msk.f32.gmra.mrb[18].mxu1 %vm1111_vm8, %v1372_v55 }
 0x4a7   : > { %3106 = vmatmul.mubr.msk.f32.gmra.mrb[18].mxu0 %vm1111_vm8, %v1144_v57  ;;  %3090 = vmatprep.mubr.msk.f32.mxu1 %vm3485_vm3, %v3486_v37 }
 0x4a8   : > { %3114 = vmatprep.mubr.msk.f32.mxu0 %vm3485_vm3, %v3486_v37  ;;  %v1786_v3 = vpop.permute.xlu0 %1785 }
 0x4a9   : > { %3113 = vmatpush3.xpose.msk.msra.mxu0 %vm1018_vm5, %v1655_v56  ;;  %3307 = vmatpush3.xpose.msk.msra.mxu1 %vm1018_vm5, %v1655_v56 }
 0x4aa   : > { %3123 = vmatprep.subr.mxu0 %v3486_v37  ;;  %3272 = vmatprep.subr.bf16.mxu1 %v3484_v34 }
 0x4ac   : > { %3115 = vmatmul.mubr.msk.f32.vlgmr.msra.gmra.mrb[20].mxu0 %vm1018_vm5, %v1645_v61  ;;  %v1976_v9 = vpop.permute.xlu0 %1975 }
 0x4ad   : > { %3124 = vmatpush3.msra.mxu0 %v888_v60  ;;  %3125 = vmatprep.mubr.msk.f32.mxu0 %vm3485_vm3, %v3486_v37 }
 0x4ae   : > { %3275 = vmatprep.subr.bf16.mxu0 %v3484_v34 }
 0x4b0   : > { %3126 = vmatmul.mubr.msk.f32.vlgmr.msra.gmra.mrb[22].mxu0 %vm1018_vm5, %v1782_v62  ;;  %v1968_v58 = vpop.permute.xlu0 %1967 }
 0x4b1   : > { %3128 = vmatprep.mubr.msk.f32.mxu0 %vm3485_vm3, %v3486_v37 }
 0x4d1   : > { %v1367_v63 = vpop.xlane.xlu1 %1366 }
 0x4d2   : > { %3406 = vrcp.f32 %v1367_v63 }
 0x4d5   : > { %v1649_v0 = vpop.permute.xlu1 %1648 }
 0x4d9   : > { %v1784_v1 = vpop.permute.xlu1 %1783 }
 0x4da   : > { %3129 = vmatmul.mubr.msk.f32.gmra.mrb[24].mxu0 %vm1018_vm5, %v1784_v1 }
 0x4db   : > { %3131 = vmatprep.mubr.msk.f32.mxu0 %vm3485_vm3, %v3486_v37 }
 0x4dc   : > { %v3407_v2 = vpop.eup %3406 }
 0x4dd   : > { %v3381_v4 = vpop.permute.xlu1 %3380  ;;  %v1373_v5 = vmul.f32 %v3407_v2, %v3895_v28 }
 0x4de   : > { %v3383_v6 = vunpack.i.h.bf16 %v3381_v4  ;;  %v3382_v7 = vunpack.i.l.bf16 %v3381_v4  ;;  %3132 = vmatmul.mubr.msk.f32.gmra.mrb[26].mxu0 %vm1018_vm5, %v1786_v3 }
 0x4df   : > { %3091 = vmatmul.mubr.msk.f32.gmra.mrb[20].mxu1 %vm1111_vm8, %v1373_v5  ;;  %3155 = vmatprep.mubr.msk.f32.mxu0 %vm3485_vm3, %v3486_v37 }
 0x4e0   : > { %v3276_v8 = vpack.c.bf16 %v3383_v6, %v3382_v7  ;;  %3117 = vmatprep.mubr.msk.f32.mxu1 %vm3485_vm3, %v3486_v37 }
 0x4e1   : > { %v1966_v10 = vpop.permute.xlu1 %1965 }
 0x4e2   : > { %3278 = vmatpush3.bf16.xpose.msk.msra.mxu0 %vm3804_vm6, %v3276_v8 }
 0x4e3   : > { %3118 = vmatmul.mubr.msk.f32.vlgmr.msra.gmra.mrb[22].mxu1 %vm1018_vm5, %v1647_v59  ;;  %3153 = vmatprep.subr.mxu0 %v3486_v37 }
 0x4e4   : > { %3120 = vmatprep.mubr.msk.f32.mxu1 %vm3485_vm3, %v3486_v37 }
 0x4e5   : > { %v1970_v11 = vpop.permute.xlu1 %1969 }
 0x4e7   : > { %3121 = vmatmul.mubr.msk.f32.gmra.mrb[24].mxu1 %vm1018_vm5, %v1649_v0 }
 0x4e8   : > { %3140 = vmatprep.mubr.msk.f32.mxu1 %vm3485_vm3, %v3486_v37 }
 0x4ea   : > { %3154 = vmatpush3.xpose.msk.msra.mxu0 %vm1018_vm5, %v1976_v9 }
 0x4eb   : > { %3279 = vmatprep.subr.bf16.mxu0 %v3484_v34 }
 0x4ed   : > { %3156 = vmatmul.mubr.msk.f32.vlgmr.msra.gmra.mrb[28].mxu0 %vm1018_vm5, %v1966_v10 }
 0x4ee   : > { %3158 = vmatprep.mubr.msk.f32.mxu0 %vm3485_vm3, %v3486_v37 }
 0x4f1   : > { %3159 = vmatmul.mubr.msk.f32.gmra.mrb[30].mxu0 %vm1018_vm5, %v1968_v58 }
 0x4f2   : > { %3161 = vmatprep.mubr.msk.f32.mxu0 %vm3485_vm3, %v3486_v37 }
 0x4f5   : > { %3162 = vmatmul.mubr.msk.f32.gmra.mrb[32].mxu0 %vm1018_vm5, %v1970_v11 }
 0x4f6   : > { %3181 = vmatprep.mubr.msk.f32.mxu0 %vm3485_vm3, %v3486_v37 }
 0x56c   : > { %v1630_v12 = vpop.f32.mrb[14].mxu0 }
 0x56d   : > { %v3101_v13 = vpop.f32.mrb[15].mxu0 }
 0x571   : > { %v1541_v14 = vpop.f32.mrb[16].mxu1 }
 0x572   : > { %v3968_v15 = vadd.f32 %v1630_v12, %v1541_v14  ;;  %v3086_v16 = vpop.f32.mrb[17].mxu1 }
 0x575   : > { %v1635_v17 = vpop.f32.mrb[16].mxu0 }
 0x576   : > { %v3104_v18 = vpop.f32.mrb[17].mxu0 }
 0x579   : > { %v1546_v19 = vpop.f32.mrb[18].mxu1 }
 0x57a   : > { %v3970_v20 = vadd.f32 %v1635_v17, %v1546_v19  ;;  %v1640_v22 = vpop.f32.mrb[18].mxu0  ;;  %v3089_v23 = vpop.f32.mrb[19].mxu1 }
 0x57b   : > { %v3107_v24 = vpop.f32.mrb[19].mxu0 }
 0x57f   : > { %v1734_v25 = vpop.f32.mrb[20].mxu0 }
 0x580   : > { %v1735_v26 = vadd.f32 %v1734_v25, %v3862_v21  ;;  %v3116_v27 = vpop.f32.mrb[21].mxu0 }
 0x582   : > { %v1748_v28 = vsel %vm1111_vm8, %v1735_v26, -inf }
 0x583   : > { %1749 = vmax.xlane.f32.xlu0 %v1748_v28  ;;  %v1859_v29 = vpop.f32.mrb[22].mxu0 }
 0x584   : > { %v3127_v30 = vpop.f32.mrb[23].mxu0 }
 0x5ad   : > { %v1864_v31 = vpop.f32.mrb[24].mxu0 }
 0x5ae   : > { %v3273_v32 = vpack.c.bf16 %v1864_v31, %v1859_v29  ;;  %v3130_v33 = vpop.f32.mrb[25].mxu0 }
 0x5b0   : > { %3274 = vmatpush3.bf16.msra.mxu1 %v3273_v32 }
 0x5b1   : > { %v1869_v35 = vpop.f32.mrb[26].mxu0  ;;  %3138 = vmatprep.subr.mxu1 %v3486_v37 }
 0x5b2   : > { %v1551_v36 = vpop.f32.mrb[20].mxu1  ;;  %v3133_v38 = vpop.f32.mrb[27].mxu0 }
 0x5b3   : > { %v3975_v50 = vadd.f32 %v1640_v22, %v1551_v36  ;;  %v3092_v42 = vpop.f32.mrb[21].mxu1 }
 0x5b4   : > { %3139 = vmatpush3.msra.mxu1 %v1869_v35 }
 0x5b5   : > { %3164 = vmatprep.subr.mxu1 %v3486_v37 }
 0x5b6   : > { %v1739_v43 = vpop.f32.mrb[22].mxu1 }
 0x5b7   : > { %v1740_v44 = vadd.f32 %v1739_v43, %v3862_v21  ;;  %v3119_v46 = vpop.f32.mrb[23].mxu1 }
 0x5b9   : > { %v1751_v47 = vsel %vm1111_vm8, %v1740_v44, -inf }
 0x5ba   : > { %1752 = vmax.xlane.f32.xlu1 %v1751_v47  ;;  %v1744_v49 = vpop.f32.mrb[24].mxu1 }
 0x5bb   : > { %v1745_v51 = vadd.f32 %v1744_v49, %v3862_v21  ;;  %v3122_v53 = vpop.f32.mrb[25].mxu1 }
 0x5bd   : > { %v1754_v54 = vsel %vm1111_vm8, %v1745_v51, -inf }
 0x5be   : > { %1755 = vmax.xlane.f32.xlu0 %v1754_v54 }
 0x5c0   : > { %v2055_v55 = vpop.f32.mrb[28].mxu0 }
 0x5c1   : > { %v3157_v56 = vpop.f32.mrb[29].mxu0  ;;  %v2056_v12 = vadd.f32 %v2055_v55, %v3862_v21 }
 0x5c3   : > { %v2069_v16 = vsel %vm1111_vm8, %v2056_v12, -inf }
 0x5c4   : > { %v2060_v57 = vpop.f32.mrb[30].mxu0 }
 0x5c5   : > { %v3160_v59 = vpop.f32.mrb[31].mxu0  ;;  %v2061_v13 = vadd.f32 %v2060_v57, %v3862_v21 }
 0x5c7   : > { %v2072_v17 = vsel %vm1111_vm8, %v2061_v13, -inf }
 0x5c8   : > { %v2065_v60 = vpop.f32.mrb[32].mxu0 }
 0x5c9   : > { %v3163_v61 = vpop.f32.mrb[33].mxu0  ;;  %v2066_v14 = vadd.f32 %v2065_v60, %v3862_v21 }
 0x5cb   : > { %v2075_v18 = vsel %vm1111_vm8, %v2066_v14, -inf }
 0x610   : > { %v1750_v62 = vpop.xlane.xlu0 %1749 }
 0x611   : > { %v1757_v63 = vsub.f32 %v1735_v26, %v1750_v62 }
 0x613   : > { %v1760_v0 = vmul.f32 1.442695, %v1757_v63 }
 0x615   : > { %3408 = vpow2.f32 %v1760_v0 }
 0x61f   : > { %v3409_v1 = vpop.eup %3408 }
 0x620   : > { %v1766_v2 = vsel %vm1111_vm8, %v3409_v1, 0.0 }
 0x621   : > { %1767 = vadd.xlane.f32.xlu0 %v1766_v2 }
 0x647   : > { %v1753_v3 = vpop.xlane.xlu1 %1752 }
 0x648   : > { %v1758_v4 = vsub.f32 %v1740_v44, %v1753_v3 }
 0x64a   : > { %v1762_v5 = vmul.f32 1.442695, %v1758_v4 }
 0x64b   : > { %v1756_v6 = vpop.xlane.xlu0 %1755 }
 0x64c   : > { %3410 = vpow2.f32 %v1762_v5  ;;  %v1759_v7 = vsub.f32 %v1745_v51, %v1756_v6 }
 0x64e   : > { %v1764_v8 = vmul.f32 1.442695, %v1759_v7 }
 0x650   : > { %3412 = vpow2.f32 %v1764_v8 }
 0x656   : > { %v3411_v9 = vpop.eup %3410 }
 0x657   : > { %v1769_v10 = vsel %vm1111_vm8, %v3411_v9, 0.0 }
 0x658   : > { %1770 = vadd.xlane.f32.xlu1 %v1769_v10 }
 0x65a   : > { %v3413_v58 = vpop.eup %3412 }
 0x65b   : > { %v1772_v11 = vsel %vm1111_vm8, %v3413_v58, 0.0 }
 0x65c   : > { %1773 = vadd.xlane.f32.xlu0 %v1772_v11 }
 0x669   : > { %2102 = vrot.lane.b32.xlu1 %v3776_v45, %s3498_s0 }
 0x66d   : > { %2106 = vrot.lane.b32.xlu1 %v3785_v52, %s3498_s0 }
 0x672   : > { %2104 = vrot.lane.b32.xlu0 %v3779_v48, %s3498_s0  ;;  %v889_v48 = vld [vmem:[%s3643_s24 + $0x18] sm:$0xff] }
 0x691   : > { %2070 = vmax.xlane.f32.xlu1 %v2069_v16  ;;  %2073 = vmax.xlane.f32.xlu0 %v2072_v17 }
 0x695   : > { %2076 = vmax.xlane.f32.xlu0 %v2075_v18 }
 0x6ae   : > { %v1768_v45 = vpop.xlane.xlu0 %1767 }
 0x6af   : > { %3414 = vrcp.f32 %v1768_v45 }
 0x6b9   : > { %v3415_v52 = vpop.eup %3414 }
 0x6ba   : > { %v1778_v19 = vmul.f32 %v3415_v52, %v3409_v1 }
 0x6bc   : > { %3141 = vmatmul.mubr.msk.f32.vlgmr.msra.gmra.mrb[26].mxu1 %vm1111_vm8, %v1778_v19 }
 0x6bd   : > { %3143 = vmatprep.mubr.msk.f32.mxu1 %vm3485_vm3, %v3486_v37  ;;  %3165 = vmatpush3.msra.mxu1 %v889_v48 }
 0x6be   : > { %3282 = vmatprep.subr.bf16.mxu1 %v3484_v34 }
 0x6e5   : > { %v1771_v21 = vpop.xlane.xlu1 %1770 }
 0x6e6   : > { %3416 = vrcp.f32 %v1771_v21 }
 0x6e9   : > { %v1774_v22 = vpop.xlane.xlu0 %1773  ;;  %v2103_v27 = vpop.permute.xlu1 %2102 }
 0x6ea   : > { %3418 = vrcp.f32 %v1774_v22 }
 0x6ed   : > { %v2105_v28 = vpop.permute.xlu0 %2104  ;;  %v2107_v29 = vpop.permute.xlu1 %2106 }
 0x6f0   : > { %v3417_v23 = vpop.eup %3416 }
 0x6f1   : > { %v1779_v24 = vmul.f32 %v3417_v23, %v3411_v9 }
 0x6f3   : > { %3144 = vmatmul.mubr.msk.f32.gmra.mrb[28].mxu1 %vm1111_vm8, %v1779_v24 }
 0x6f4   : > { %v3419_v25 = vpop.eup %3418  ;;  %3146 = vmatprep.mubr.msk.f32.mxu1 %vm3485_vm3, %v3486_v37 }
 0x6f5   : > { %v1780_v26 = vmul.f32 %v3419_v25, %v3413_v58 }
 0x6f7   : > { %3147 = vmatmul.mubr.msk.f32.gmra.mrb[30].mxu1 %vm1111_vm8, %v1780_v26 }
 0x6f8   : > { %3166 = vmatprep.mubr.msk.f32.mxu1 %vm3485_vm3, %v3486_v37 }
 0x6fb   : > { %3167 = vmatmul.mubr.msk.f32.vlgmr.msra.gmra.mrb[32].mxu1 %vm1018_vm5, %v2103_v27 }
 0x6fc   : > { %3169 = vmatprep.mubr.msk.f32.mxu1 %vm3485_vm3, %v3486_v37 }
 0x6ff   : > { %3170 = vmatmul.mubr.msk.f32.gmra.mrb[34].mxu1 %vm1018_vm5, %v2105_v28 }
 0x700   : > { %3172 = vmatprep.mubr.msk.f32.mxu1 %vm3485_vm3, %v3486_v37 }
 0x703   : > { %3173 = vmatmul.mubr.msk.f32.gmra.mrb[36].mxu1 %vm1018_vm5, %v2107_v29 }
 0x704   : > { %3198 = vmatprep.mubr.msk.f32.mxu1 %vm3485_vm3, %v3486_v37 }
 0x71e   : > { %v2071_v30 = vpop.xlane.xlu1 %2070  ;;  %v2074_v31 = vpop.xlane.xlu0 %2073 }
 0x71f   : > { %v2078_v32 = vsub.f32 %v2056_v12, %v2071_v30  ;;  %v2079_v33 = vsub.f32 %v2061_v13, %v2074_v31  ;;  %v2871_v12 = vld [vmem:[%s4186_s19] ss:$0 sm:$0xff] }
 0x721   : > { %v2081_v35 = vmul.f32 1.442695, %v2078_v32  ;;  %v2083_v36 = vmul.f32 1.442695, %v2079_v33 }
 0x722   : > { %v2077_v38 = vpop.xlane.xlu0 %2076 }
 0x723   : > { %3420 = vpow2.f32 %v2081_v35  ;;  %v2080_v42 = vsub.f32 %v2066_v14, %v2077_v38 }
 0x724   : > { %3422 = vpow2.f32 %v2083_v36 }
 0x725   : > { %v2085_v43 = vmul.f32 1.442695, %v2080_v42 }
 0x727   : > { %3424 = vpow2.f32 %v2085_v43 }
 0x72d   : > { %v3421_v44 = vpop.eup %3420 }
 0x72e   : > { %v3423_v46 = vpop.eup %3422  ;;  %v2087_v47 = vsel %vm1111_vm8, %v3421_v44, 0.0 }
 0x72f   : > { %2088 = vadd.xlane.f32.xlu1 %v2087_v47  ;;  %v2090_v49 = vsel %vm1111_vm8, %v3423_v46, 0.0 }
 0x730   : > { %2091 = vadd.xlane.f32.xlu0 %v2090_v49  ;;  %v891_v49 = vld [vmem:[%s3652_s21] sm:$0xff] }
 0x731   : > { %v3425_v51 = vpop.eup %3424 }
 0x732   : > { %v2093_v53 = vsel %vm1111_vm8, %v3425_v51, 0.0 }
 0x733   : > { %2094 = vadd.xlane.f32.xlu1 %v2093_v53 }
 0x78f   : > { %v1948_v54 = vpop.f32.mrb[26].mxu1 }
 0x790   : > { %v1962_v55 = vadd.f32 %v1948_v54, %v3968_v15  ;;  %v3142_v56 = vpop.f32.mrb[27].mxu1  ;;  %v893_v54 = vld [vmem:[%s3652_s21 + $0x10] sm:$0xff] }
 0x7bc   : > { %v2089_v61 = vpop.xlane.xlu1 %2088 }
 0x7bd   : > { %3426 = vrcp.f32 %v2089_v61  ;;  %v2092_v1 = vpop.xlane.xlu0 %2091 }
 0x7be   : > { %3428 = vrcp.f32 %v2092_v1  ;;  %v901_v1 = vld [vmem:[%s3666_s6 + $0x28] sm:$0xff] }
 0x7c0   : > { %v2095_v4 = vpop.xlane.xlu1 %2094 }
 0x7c1   : > { %3430 = vrcp.f32 %v2095_v4 }
 0x7c6   : > { %v1953_v57 = vpop.f32.mrb[28].mxu1 }
 0x7c7   : > { %v1963_v59 = vadd.f32 %v1953_v57, %v3970_v20  ;;  %v3145_v60 = vpop.f32.mrb[29].mxu1  ;;  %v3427_v7 = vpop.eup %3426  ;;  %v896_v57 = vld [vmem:[%s3666_s6] sm:$0xff] }
 0x7c8   : > { %v2099_v9 = vmul.f32 %v3427_v7, %v3421_v44  ;;  %v3429_v10 = vpop.eup %3428  ;;  %v898_v60 = vld [vmem:[%s3666_s6 + $0x10] sm:$0xff] }
 0x7ca   : > { %v1958_v62 = vpop.f32.mrb[30].mxu1 }
 0x7cb   : > { %v1964_v63 = vadd.f32 %v1958_v62, %v3975_v50  ;;  %v3148_v0 = vpop.f32.mrb[31].mxu1  ;;  %v2100_v50 = vmul.f32 %v3429_v10, %v3423_v46  ;;  %v3431_v58 = vpop.eup %3430  ;;  %v899_v62 = vld [vmem:[%s3666_s6 + $0x18] sm:$0xff] }
 0x7cc   : > { %v2101_v11 = vmul.f32 %v3431_v58, %v3425_v51  ;;  %v892_v51 = vld [vmem:[%s3652_s21 + $0x8] sm:$0xff]  ;;  %v900_v0 = vld [vmem:[%s3666_s6 + $0x20] sm:$0xff] }
 0x7cd   : > { %v3283_v53 = vpack.c.bf16 %v892_v51, %v891_v49  ;;  %v2873_v58 = vld [vmem:[%s741_s18] ss:$0 sm:$0xff] }
 0x7ce   : > { %v2180_v2 = vpop.f32.mrb[32].mxu1 }
 0x7cf   : > { %v3168_v3 = vpop.f32.mrb[33].mxu1  ;;  %3284 = vmatpush3.bf16.msra.mxu1 %v3283_v53 }
 0x7d0   : > { %3285 = vmatprep.subr.bf16.mxu1 %v3484_v34 }
 0x7d2   : > { %v2185_v5 = vpop.f32.mrb[34].mxu1 }
 0x7d3   : > { %v3280_v6 = vpack.c.bf16 %v2185_v5, %v2180_v2  ;;  %v3171_v15 = vpop.f32.mrb[35].mxu1  ;;  %v3295_v2 = vpack.c.bf16 %v901_v1, %v900_v0 }
 0x7d5   : > { %3281 = vmatpush3.bf16.msra.mxu0 %v3280_v6 }
 0x7d6   : > { %v2190_v8 = vpop.f32.mrb[36].mxu1  ;;  %3179 = vmatprep.subr.mxu0 %v3486_v37 }
 0x7d7   : > { %v3174_v20 = vpop.f32.mrb[37].mxu1 }
 0x7d9   : > { %3180 = vmatpush3.msra.mxu0 %v2190_v8 }
 0x7da   : > { %3182 = vmatmul.mubr.msk.f32.vlgmr.msra.gmra.mrb[34].mxu0 %vm1111_vm8, %v2099_v9  ;;  %3288 = vmatprep.subr.bf16.mxu0 %v3484_v34 }
 0x7db   : > { %3184 = vmatprep.mubr.msk.f32.mxu0 %vm3485_vm3, %v3486_v37 }
 0x7de   : > { %3185 = vmatmul.mubr.msk.f32.gmra.mrb[36].mxu0 %vm1111_vm8, %v2100_v50  ;;  %v2872_v50 = vld [vmem:[%s738_s1] ss:$0 sm:$0xff] }
 0x7df   : > { %3187 = vmatprep.mubr.msk.f32.mxu0 %vm3485_vm3, %v3486_v37 }
 0x7e2   : > { %3188 = vmatmul.mubr.msk.f32.gmra.mrb[38].mxu0 %vm1111_vm8, %v2101_v11 }
 0x7e3   : > { %3223 = vmatprep.mubr.msk.f32.mxu0 %vm3485_vm3, %v3486_v37 }
 0x8ad   : > { %v2269_v13 = vpop.f32.mrb[34].mxu0 }
 0x8ae   : > { %v2283_v14 = vadd.f32 %v2269_v13, %v1962_v55  ;;  %v3183_v16 = vpop.f32.mrb[35].mxu0  ;;  %v894_v55 = vld [vmem:[%s3652_s21 + $0x18] sm:$0xff] }
 0x8af   : > { %v3286_v56 = vpack.c.bf16 %v894_v55, %v893_v54 }
 0x8b0   : > { %v2292_v17 = vadd.f32 %v2871_v12, %v2283_v14 }
 0x8b1   : > { %v2274_v18 = vpop.f32.mrb[36].mxu0  ;;  %3287 = vmatpush3.bf16.msra.mxu1 %v3286_v56 }
 0x8b2   : > { %v2284_v45 = vadd.f32 %v2274_v18, %v1963_v59  ;;  %v3186_v52 = vpop.f32.mrb[37].mxu0  ;;  %v2295_v19 = vadd.f32 %v2292_v17, %v3748_v39  ;;  %v897_v59 = vld [vmem:[%s3666_s6 + $0x8] sm:$0xff] }
 0x8b3   : > { %v3289_v61 = vpack.c.bf16 %v897_v59, %v896_v57 }
 0x8b4   : > { %v2293_v48 = vadd.f32 %v2871_v12, %v2284_v45  ;;  %v2298_v21 = vsel %vm919_vm4, %v2295_v19, 0.0 }
 0x8b5   : > { %2299 = vadd.xlane.f32.xlu0 %v2298_v21  ;;  %v2279_v22 = vpop.f32.mrb[38].mxu0  ;;  %3290 = vmatpush3.bf16.msra.mxu0 %v3289_v61  ;;  %v903_v21 = vld [vmem:[%s3666_s6 + $0x38] sm:$0xff] }
 0x8b6   : > { %v2285_v23 = vadd.f32 %v2279_v22, %v1964_v63  ;;  %v3189_v24 = vpop.f32.mrb[39].mxu0  ;;  %v2296_v25 = vadd.f32 %v2293_v48, %v3756_v40  ;;  %v3292_v63 = vpack.c.bf16 %v899_v62, %v898_v60  ;;  %3291 = vmatprep.subr.bf16.mxu0 %v3484_v34  ;;  %v902_v48 = vld [vmem:[%s3666_s6 + $0x30] sm:$0xff] }
 0x8b7   : > { %v3298_v22 = vpack.c.bf16 %v903_v21, %v902_v48 }
 0x8b8   : > { %v2294_v26 = vadd.f32 %v2871_v12, %v2285_v23  ;;  %v2301_v27 = vsel %vm919_vm4, %v2296_v25, 0.0  ;;  %v2874_v23 = vld [vmem:[%s4187_s7] ss:$0 sm:$0xff] }
 0x8b9   : > { %2302 = vadd.xlane.f32.xlu1 %v2301_v27  ;;  %3293 = vmatpush3.bf16.msra.mxu0 %v3292_v63 }
 0x8ba   : > { %v2297_v28 = vadd.f32 %v2294_v26, %v3763_v41  ;;  %3294 = vmatprep.subr.bf16.mxu0 %v3484_v34 }
 0x8bc   : > { %v2304_v29 = vsel %vm919_vm4, %v2297_v28, 0.0 }
 0x8bd   : > { %2305 = vadd.xlane.f32.xlu0 %v2304_v29  ;;  %3296 = vmatpush3.bf16.msra.mxu0 %v3295_v2 }
 0x8be   : > { %3297 = vmatprep.subr.bf16.mxu0 %v3484_v34 }
 0x8c1   : > { %3299 = vmatpush3.bf16.msra.mxu0 %v3298_v22 }
 0x942   : > { %v2300_v30 = vpop.xlane.xlu0 %2299 }
 0x943   : > { %v2308_v39 = vmul.f32 0.03125, %v2300_v30 }
 0x945   : > { %v2311_v31 = vsub.f32 %v2295_v19, %v2308_v39 }
 0x946   : > { %v2303_v32 = vpop.xlane.xlu1 %2302 }
 0x947   : > { %v2309_v33 = vmul.f32 0.03125, %v2303_v32  ;;  %v2314_v35 = vmul.f32 %v2311_v31, %v2311_v31 }
 0x949   : > { %v2312_v36 = vsub.f32 %v2296_v25, %v2309_v33  ;;  %v2317_v40 = vsel %vm919_vm4, %v2314_v35, 0.0 }
 0x94a   : > { %2318 = vadd.xlane.f32.xlu1 %v2317_v40  ;;  %v2306_v38 = vpop.xlane.xlu0 %2305 }
 0x94b   : > { %v2310_v42 = vmul.f32 0.03125, %v2306_v38  ;;  %v2315_v41 = vmul.f32 %v2312_v36, %v2312_v36 }
 0x94d   : > { %v2313_v43 = vsub.f32 %v2297_v28, %v2310_v42  ;;  %v2320_v44 = vsel %vm919_vm4, %v2315_v41, 0.0 }
 0x94e   : > { %2321 = vadd.xlane.f32.xlu0 %v2320_v44 }
 0x94f   : > { %v2316_v46 = vmul.f32 %v2313_v43, %v2313_v43 }
 0x951   : > { %v2323_v47 = vsel %vm919_vm4, %v2316_v46, 0.0 }
 0x952   : > { %2324 = vadd.xlane.f32.xlu1 %v2323_v47 }
 0x9d7   : > { %v2319_v3 = vpop.xlane.xlu1 %2318 }
 0x9d8   : > { %v2326_v4 = vmul.f32 0.03125, %v2319_v3 }
 0x9da   : > { %v2329_v5 = vadd.f32 1e-05, %v2326_v4 }
 0x9db   : > { %v2322_v6 = vpop.xlane.xlu0 %2321 }
 0x9dc   : > { %3432 = vrsqrt.f32 %v2329_v5  ;;  %v2327_v15 = vmul.f32 0.03125, %v2322_v6 }
 0x9de   : > { %v2330_v7 = vadd.f32 1e-05, %v2327_v15 }
 0x9df   : > { %v2325_v8 = vpop.xlane.xlu1 %2324 }
 0x9e0   : > { %3434 = vrsqrt.f32 %v2330_v7  ;;  %v2328_v20 = vmul.f32 0.03125, %v2325_v8 }
 0x9e2   : > { %v2331_v9 = vadd.f32 1e-05, %v2328_v20 }
 0x9e4   : > { %3436 = vrsqrt.f32 %v2331_v9 }
 0x9e6   : > { %v3433_v10 = vpop.eup %3432 }
 0x9e7   : > { %v2335_v34 = vmul.f32 %v3433_v10, %v2311_v31 }
 0x9e9   : > { %v2344_v11 = vmul.f32 %v2872_v50, %v2335_v34 }
 0x9ea   : > { %v3435_v12 = vpop.eup %3434 }
 0x9eb   : > { %v2353_v13 = vadd.f32 %v2873_v58, %v2344_v11  ;;  %v2336_v14 = vmul.f32 %v3435_v12, %v2312_v36  ;;  %v2878_v36 = vld [vmem:[%s4188_s17] ss:$0 sm:$0xff] }
 0x9ed   : > { %3199 = vmatmul.mubr.msk.f32.vlgmr.msra.gmra.mrb[38].mxu1 %vm919_vm4, %v2353_v13  ;;  %v2345_v16 = vmul.f32 %v2872_v50, %v2336_v14  ;;  %v2882_v14 = vld [vmem:[%s744_s5] ss:$0 sm:$0xff] }
 0x9ee   : > { %v3437_v17 = vpop.eup %3436  ;;  %3201 = vmatprep.mubr.msk.f32.mxu1 %vm3485_vm3, %v3486_v37 }
 0x9ef   : > { %v2354_v18 = vadd.f32 %v2873_v58, %v2345_v16  ;;  %v2337_v45 = vmul.f32 %v3437_v17, %v2313_v43  ;;  %v2883_v17 = vld [vmem:[%s747_s28] ss:$0 sm:$0xff] }
 0x9f1   : > { %3202 = vmatmul.mubr.msk.f32.gmra.mrb[40].mxu1 %vm919_vm4, %v2354_v18  ;;  %v2346_v52 = vmul.f32 %v2872_v50, %v2337_v45 }
 0x9f2   : > { %3204 = vmatprep.mubr.msk.f32.mxu1 %vm3485_vm3, %v3486_v37 }
 0x9f3   : > { %v2355_v19 = vadd.f32 %v2873_v58, %v2346_v52 }
 0x9f5   : > { %3205 = vmatmul.mubr.msk.f32.gmra.mrb[42].mxu1 %vm919_vm4, %v2355_v19 }
 0xac0   : > { %v2437_v24 = vpop.f32.mrb[38].mxu1 }
 0xac1   : > { %v2438_v25 = vadd.f32 %v2874_v23, %v2437_v24  ;;  %v3200_v26 = vpop.f32.mrb[39].mxu1 }
 0xac3   : > { %v2451_v27 = vmax.f32 %v2438_v25, 0.0 }
 0xac4   : > { %v2442_v28 = vpop.f32.mrb[40].mxu1 }
 0xac5   : > { %v2443_v29 = vadd.f32 %v2874_v23, %v2442_v28  ;;  %v3203_v30 = vpop.f32.mrb[41].mxu1  ;;  %3224 = vmatmul.mubr.msk.f32.vlgmr.msra.gmra.mrb[40].mxu0 %vm2460_vm9, %v2451_v27 }
 0xac6   : > { %3226 = vmatprep.mubr.msk.f32.mxu0 %vm3485_vm3, %v3486_v37 }
 0xac7   : > { %v2452_v39 = vmax.f32 %v2443_v29, 0.0 }
 0xac8   : > { %v2447_v31 = vpop.f32.mrb[42].mxu1 }
 0xac9   : > { %v2448_v32 = vadd.f32 %v2874_v23, %v2447_v31  ;;  %v3206_v33 = vpop.f32.mrb[43].mxu1  ;;  %3227 = vmatmul.mubr.msk.f32.gmra.mrb[42].mxu0 %vm2460_vm9, %v2452_v39 }
 0xaca   : > { %3229 = vmatprep.mubr.msk.f32.mxu0 %vm3485_vm3, %v3486_v37 }
 0xacb   : > { %v2453_v35 = vmax.f32 %v2448_v32, 0.0 }
 0xacd   : > { %3230 = vmatmul.mubr.msk.f32.gmra.mrb[44].mxu0 %vm2460_vm9, %v2453_v35 }
 0xb98   : > { %v2536_v40 = vpop.f32.mrb[40].mxu0 }
 0xb99   : > { %v2537_v38 = vadd.f32 %v2878_v36, %v2536_v40  ;;  %v3225_v42 = vpop.f32.mrb[41].mxu0 }
 0xb9b   : > { %v2550_v41 = vadd.f32 %v2537_v38, %v2353_v13 }
 0xb9c   : > { %v2541_v43 = vpop.f32.mrb[42].mxu0 }
 0xb9d   : > { %v2542_v44 = vadd.f32 %v2878_v36, %v2541_v43  ;;  %v3228_v46 = vpop.f32.mrb[43].mxu0  ;;  %v2553_v47 = vsel %vm919_vm4, %v2550_v41, 0.0 }
 0xb9e   : > { %2554 = vadd.xlane.f32.xlu0 %v2553_v47 }
 0xb9f   : > { %v2551_v49 = vadd.f32 %v2542_v44, %v2354_v18 }
 0xba0   : > { %v2546_v51 = vpop.f32.mrb[44].mxu0 }
 0xba1   : > { %v2547_v37 = vadd.f32 %v2878_v36, %v2546_v51  ;;  %v3231_v53 = vpop.f32.mrb[45].mxu0  ;;  %v2556_v54 = vsel %vm919_vm4, %v2551_v49, 0.0 }
 0xba2   : > { %2557 = vadd.xlane.f32.xlu1 %v2556_v54 }
 0xba3   : > { %v2552_v55 = vadd.f32 %v2547_v37, %v2355_v19 }
 0xba5   : > { %v2559_v56 = vsel %vm919_vm4, %v2552_v55, 0.0 }
 0xba6   : > { %2560 = vadd.xlane.f32.xlu0 %v2559_v56 }
 0xc2b   : > { %v2555_v57 = vpop.xlane.xlu0 %2554 }
 0xc2c   : > { %v2562_v59 = vmul.f32 0.03125, %v2555_v57 }
 0xc2e   : > { %v2565_v60 = vsub.f32 %v2550_v41, %v2562_v59 }
 0xc2f   : > { %v2558_v61 = vpop.xlane.xlu1 %2557 }
 0xc30   : > { %v2563_v62 = vmul.f32 0.03125, %v2558_v61  ;;  %v2568_v63 = vmul.f32 %v2565_v60, %v2565_v60 }
 0xc32   : > { %v2566_v0 = vsub.f32 %v2551_v49, %v2563_v62  ;;  %v2571_v1 = vsel %vm919_vm4, %v2568_v63, 0.0 }
 0xc33   : > { %2572 = vadd.xlane.f32.xlu1 %v2571_v1  ;;  %v2561_v2 = vpop.xlane.xlu0 %2560 }
 0xc34   : > { %v2564_v3 = vmul.f32 0.03125, %v2561_v2  ;;  %v2569_v4 = vmul.f32 %v2566_v0, %v2566_v0 }
 0xc36   : > { %v2567_v5 = vsub.f32 %v2552_v55, %v2564_v3  ;;  %v2574_v6 = vsel %vm919_vm4, %v2569_v4, 0.0 }
 0xc37   : > { %2575 = vadd.xlane.f32.xlu0 %v2574_v6 }
 0xc38   : > { %v2570_v15 = vmul.f32 %v2567_v5, %v2567_v5 }
 0xc3a   : > { %v2577_v7 = vsel %vm919_vm4, %v2570_v15, 0.0 }
 0xc3b   : > { %2578 = vadd.xlane.f32.xlu1 %v2577_v7 }
 0xcc0   : > { %v2573_v8 = vpop.xlane.xlu1 %2572 }
 0xcc1   : > { %v2580_v20 = vmul.f32 0.03125, %v2573_v8 }
 0xcc3   : > { %v2583_v9 = vadd.f32 1e-05, %v2580_v20 }
 0xcc4   : > { %v2576_v10 = vpop.xlane.xlu0 %2575 }
 0xcc5   : > { %3438 = vrsqrt.f32 %v2583_v9  ;;  %v2581_v50 = vmul.f32 0.03125, %v2576_v10 }
 0xcc7   : > { %v2584_v34 = vadd.f32 1e-05, %v2581_v50 }
 0xcc8   : > { %v2579_v58 = vpop.xlane.xlu1 %2578 }
 0xcc9   : > { %3440 = vrsqrt.f32 %v2584_v34  ;;  %v2582_v11 = vmul.f32 0.03125, %v2579_v58 }
 0xccb   : > { %v2585_v12 = vadd.f32 1e-05, %v2582_v11 }
 0xccd   : > { %3442 = vrsqrt.f32 %v2585_v12 }
 0xccf   : > { %v3439_v13 = vpop.eup %3438 }
 0xcd0   : > { %v2589_v16 = vmul.f32 %v3439_v13, %v2565_v60 }
 0xcd2   : > { %v2598_v18 = vmul.f32 %v2882_v14, %v2589_v16 }
 0xcd3   : > { %v3441_v45 = vpop.eup %3440 }
 0xcd4   : > { %v2607_v52 = vadd.f32 %v2883_v17, %v2598_v18  ;;  %v2590_v19 = vmul.f32 %v3441_v45, %v2566_v0 }
 0xcd6   : > { %2610 = vst.msk [vmem:[%s3687_s4] sm:$0xff] %vm919_vm4, %v2607_v52  ;;  %v2599_v48 = vmul.f32 %v2882_v14, %v2590_v19 }
 0xcd7   : > { %v3443_v21 = vpop.eup %3442 }
 0xcd8   : > { %v2608_v22 = vadd.f32 %v2883_v17, %v2599_v48  ;;  %v2591_v23 = vmul.f32 %v3443_v21, %v2567_v5 }
 0xcda   : > { %2611 = vst.msk [vmem:[%s3687_s4 + $0x8] sm:$0xff] %vm919_vm4, %v2608_v22  ;;  %v2600_v24 = vmul.f32 %v2882_v14, %v2591_v23 }
 0xcdc   : > { %v2609_v25 = vadd.f32 %v2883_v17, %v2600_v24 }
 0xcde   : > { %2612 = vst.msk [vmem:[%s3687_s4 + $0x10] sm:$0xff] %vm919_vm4, %v2609_v25 }
 0xcdf PF: > { %s4189_s5 = sld [smem:[#allocation5_spill]]  ;;  %s4190_s24 = sld [smem:[#allocation3_spill]] }
 0xce0   : > { %s4191_s25 = sld [smem:[#allocation4_spill]]  ;;  %s4192_s26 = sld [smem:[#allocation6_spill]] }
 0xce1   : > { %s4193_s27 = sld [smem:[#allocation7_spill]] }
 0xce5   : > { %s27_s28 = sadd.s32 1, %s4189_s5  }
 0xce6   : > { %p24_p8 = scmp.ge.s32.totalorder %s27_s28, 6  }
 0xce8   :  { %26 = sbr.rel (!%p24_p8) target bundleno = 12 (0xc), region = 158 }

</bundles_post_ra>
